<compile_context>
chip_gen: v6e
topology: v6e:2x2x1
jax: 0.10.0
libtpu: 0.0.40
codegen_flags: <defaults>
</compile_context>

<pallas_src>
import functools

import jax
import jax.numpy as jnp
from jax.experimental import pallas as pl
from jax.experimental.pallas import tpu as pltpu


def _round_up(x: int, m: int) -> int:
    return (x + m - 1) // m * m


def _vmem_capacity_bytes() -> int:
    """Per-core VMEM capacity; conservative 64 MiB fallback (v7x per-TC)."""
    default = 64 * 1024 * 1024
    try:
        info = pltpu.get_tpu_info()
        return int(getattr(info, "vmem_capacity_bytes", default))
    except Exception:
        return default


def _footprint_bytes(tm, tk, d_in_p, d_out_p, x_itemsize, out_itemsize):
    """VMEM bytes for one grid step (double-buffered streams + scratch + temps)."""
    f32, bf16 = 4, 2
    weights = 2 * (d_in_p * tk + tk * d_out_p) * bf16      # W1 / W2 blocks (x2 buffers)
    biases = 2 * 8 * (tk + d_out_p) * f32                  # b1 / b2 (sublane-padded)
    stream = 2 * tm * (d_in_p * x_itemsize + d_out_p * out_itemsize)  # x / out blocks
    scratch = tm * d_out_p * f32                            # f32 accumulator
    temps = tm * tk * (f32 + bf16)                          # f32 h + bf16 cast copy
    return weights + biases + stream + scratch + temps


def _select_tiles(H, d_in_p, d_out_p, budget, max_tk=None):
    """Pick (tm_cap, tk) that fit the per-generation VMEM budget."""
    f32, bf16 = 4, 2
    h_full = _round_up(H, 256) if H > 128 else _round_up(H, 128)
    if max_tk is not None:
        h_full = min(h_full, _round_up(max_tk, 128))

    # Hidden tile: prefer full residency (weights DMA'd from HBM exactly once).
    tk_cands = [h_full] + [t for t in (4096, 2048, 1024, 512, 256, 128) if t < h_full]
    tk = tk_cands[-1]
    for cand in tk_cands:
        w_bytes = 2 * (d_in_p * cand + cand * d_out_p) * bf16 + 2 * 8 * (cand + d_out_p) * f32
        if w_bytes <= 0.4 * budget:
            tk = cand
            break
    w_bytes = 2 * (d_in_p * tk + tk * d_out_p) * bf16 + 2 * 8 * (tk + d_out_p) * f32

    # Batch tile: biggest candidate that keeps everything inside the budget.
    tm_cap = 8
    for cand in (1024, 768, 512, 384, 256, 192, 128, 64, 32, 16, 8):
        if w_bytes + _footprint_bytes(cand, tk, d_in_p, d_out_p, bf16, f32) - w_bytes <= budget - w_bytes:
            # (equivalent to full footprint <= budget; kept explicit for clarity)
            if _footprint_bytes(cand, tk, d_in_p, d_out_p, bf16, f32) <= budget:
                tm_cap = cand
                break
    return tm_cap, tk


def _mlp_kernel(x_ref, w1_ref, b1_ref, w2_ref, b2_ref, o_ref, acc_ref):
    k = pl.program_id(1)

    @pl.when(k == 0)
    def _init():
        # Seed the accumulator with the layer-2 bias (saves the epilogue add).
        acc_ref[...] = jnp.zeros_like(acc_ref) + b2_ref[...]

    # Layer 1 for one hidden tile: bf16 MXU matmul, f32 bias + ReLU.
    h = jnp.dot(x_ref[...], w1_ref[...], preferred_element_type=jnp.float32)
    h = jnp.maximum(h + b1_ref[...], 0.0)

    # Layer-2 partial product (bf16 MXU), accumulated in the f32 scratch.
    acc_ref[...] += jnp.dot(h.astype(w2_ref.dtype), w2_ref[...],
                            preferred_element_type=jnp.float32)

    @pl.when(k == pl.num_programs(1) - 1)
    def _finalize():
        o_ref[...] = acc_ref[...].astype(o_ref.dtype)


def prepare_mlp(w1, b1, w2, b2, *, max_tk=None):
    """One-time parameter prep (hoisted out of the per-call hot path).

    Accepts torch.nn.Linear layout: w1 [H, D_in], b1 [H], w2 [D_out, H], b2 [D_out].
    Returns (padded/cast params, static config for mlp_forward).
    """
    H, D_in = w1.shape
    D_out = w2.shape[0]
    assert w2.shape[1] == H and b1.shape == (H,) and b2.shape == (D_out,)

    vmem_cap = _vmem_capacity_bytes()
    budget = int(0.85 * vmem_cap)

    d_in_p = _round_up(D_in, 128)
    d_out_p = _round_up(D_out, 256) if D_out > 128 else _round_up(D_out, 128)
    tm_cap, tk = _select_tiles(H, d_in_p, d_out_p, budget, max_tk)
    h_p = _round_up(H, tk)

    # [out, in] -> [in, out], pad (exact zero padding), cast weights to bf16.
    w1_io = jnp.pad(w1.T, ((0, d_in_p - D_in), (0, h_p - H))).astype(jnp.bfloat16)
    w2_io = jnp.pad(w2.T, ((0, h_p - H), (0, d_out_p - D_out))).astype(jnp.bfloat16)
    b1_p = jnp.pad(b1.reshape(1, H), ((0, 0), (0, h_p - H))).astype(jnp.float32)
    b2_p = jnp.pad(b2.reshape(1, D_out), ((0, 0), (0, d_out_p - D_out))).astype(jnp.float32)

    params = (w1_io, b1_p, w2_io, b2_p)
    cfg = dict(d_out=D_out, tm_cap=tm_cap, tk=tk, vmem_cap=vmem_cap)
    return params, cfg


def mlp_forward(x, w1_p, b1_p, w2_p, b2_p, *, d_out, tm_cap, tk, vmem_cap):
    """x: [B, D_in] (any float dtype); params come from prepare_mlp."""
    B, D_in = x.shape
    d_in_p, h_p = w1_p.shape
    d_out_p = w2_p.shape[1]
    assert D_in <= d_in_p
    out_dtype = x.dtype

    tm = min(tm_cap, _round_up(B, 8))
    b_p = _round_up(B, tm)

    # Per-call: pad x only (skip when already aligned), then cast to bf16.
    if (b_p, d_in_p) != (B, D_in):
        x = jnp.pad(x, ((0, b_p - B), (0, d_in_p - D_in)))
    x = x.astype(jnp.bfloat16)

    nb, nk = b_p // tm, h_p // tk
    grid = (nb, nk)

    footprint = _footprint_bytes(tm, tk, d_in_p, d_out_p, 2, out_dtype.itemsize)
    vmem_limit = int(min(0.92 * vmem_cap, max(32 * 1024 * 1024, 1.25 * footprint)))

    flops = 2 * b_p * (d_in_p * h_p + h_p * d_out_p)
    weight_passes = 1 if nk == 1 else nb  # weights re-streamed per batch tile only if k-tiled
    bytes_accessed = int(b_p * d_in_p * 2 + b_p * d_out_p * out_dtype.itemsize
                         + weight_passes * (d_in_p * h_p + h_p * d_out_p) * 2
                         + (h_p + d_out_p) * 4)

    out_p = pl.pallas_call(
        _mlp_kernel,
        out_shape=jax.ShapeDtypeStruct((b_p, d_out_p), out_dtype),
        grid=grid,
        in_specs=[
            pl.BlockSpec((tm, d_in_p), lambda i, k: (i, 0)),    # x: moves with batch
            pl.BlockSpec((d_in_p, tk), lambda i, k: (0, k)),    # W1 (bf16)
            pl.BlockSpec((1, tk),      lambda i, k: (0, k)),    # b1 (f32)
            pl.BlockSpec((tk, d_out_p), lambda i, k: (k, 0)),   # W2 (bf16)
            pl.BlockSpec((1, d_out_p), lambda i, k: (0, 0)),    # b2 (f32, init only)
        ],
        out_specs=pl.BlockSpec((tm, d_out_p), lambda i, k: (i, 0)),
        scratch_shapes=[pltpu.VMEM((tm, d_out_p), jnp.float32)],
        compiler_params=pltpu.CompilerParams(
            dimension_semantics=("parallel", "arbitrary"),
            vmem_limit_bytes=vmem_limit,
        ),
        cost_estimate=pl.CostEstimate(
            flops=flops, transcendentals=0, bytes_accessed=bytes_accessed),
    )(x, w1_p, b1_p, w2_p, b2_p)

    return out_p[:B, :d_out]


def init_params(key, input_dim, hidden_dim, output_dim, dtype=jnp.float32):
    """torch.nn.Linear-style init: weights [out, in], biases [out],
    uniform(+/- 1/sqrt(fan_in))."""
    k1, k2, k3, k4 = jax.random.split(key, 4)
    bound1 = 1.0 / (input_dim ** 0.5)
    bound2 = 1.0 / (hidden_dim ** 0.5)
    w1 = jax.random.uniform(k1, (hidden_dim, input_dim), dtype, -bound1, bound1)
    b1 = jax.random.uniform(k2, (hidden_dim,), dtype, -bound1, bound1)
    w2 = jax.random.uniform(k3, (output_dim, hidden_dim), dtype, -bound2, bound2)
    b2 = jax.random.uniform(k4, (output_dim,), dtype, -bound2, bound2)
    return w1, b1, w2, b2


if __name__ == "__main__":
    # Small-but-representative dims: exercises hidden padding/tiling and
    # output-lane padding (96 -> 128).
    input_dim, hidden_dim, output_dim = 128, 512, 96
    batch = 256

    key = jax.random.PRNGKey(0)
    kx, kp = jax.random.split(key)
    x = jax.random.normal(kx, (batch, input_dim), jnp.float32)
    w1, b1, w2, b2 = init_params(kp, input_dim, hidden_dim, output_dim)

    # Reference emulating the kernel's numerics: bf16-rounded matmul inputs,
    # f32 accumulation, f32 bias/ReLU.
    def _bf(a):
        return a.astype(jnp.bfloat16).astype(jnp.float32)

    h_ref = jnp.maximum(_bf(x) @ _bf(w1.T) + b1[None, :], 0.0)
    ref = _bf(h_ref) @ _bf(w2.T) + b2[None, :]

    # Path 1: default plan (weights fully VMEM-resident, single hidden tile).
    params_p, cfg = prepare_mlp(w1, b1, w2, b2)
    run = jax.jit(functools.partial(mlp_forward, **cfg))
    out = run(x, *params_p)
    jax.block_until_ready(out)
    assert out.shape == (batch, output_dim)
    assert jnp.allclose(out, ref, atol=1e-2, rtol=1e-2), \
        float(jnp.max(jnp.abs(out - ref)))

    # Path 2: force hidden-dim tiling (2 reduction steps) to exercise the
    # accumulator init/finalize path.
    params_p2, cfg2 = prepare_mlp(w1, b1, w2, b2, max_tk=256)
    run2 = jax.jit(functools.partial(mlp_forward, **cfg2))
    out2 = run2(x, *params_p2)
    jax.block_until_ready(out2)
    assert jnp.allclose(out2, ref, atol=1e-2, rtol=1e-2), \
        float(jnp.max(jnp.abs(out2 - ref)))

    print("KERNEL_OK")
</pallas_src>

<mosaic_0001>
module attributes {stable_mosaic.version = 11 : i64} {
  func.func @_mlp_kernel(%arg0: i32, %arg1: i32, %arg2: memref<256x128xbf16, #tpu.memory_space<vmem>>, %arg3: memref<128x512xbf16, #tpu.memory_space<vmem>>, %arg4: memref<1x512xf32, #tpu.memory_space<vmem>>, %arg5: memref<512x128xbf16, #tpu.memory_space<vmem>>, %arg6: memref<1x128xf32, #tpu.memory_space<vmem>>, %arg7: memref<256x128xf32, #tpu.memory_space<vmem>>, %arg8: memref<256x128xf32, #tpu.memory_space<vmem>>) attributes {dimension_semantics = [#tpu.dimension_semantics<parallel>, #tpu.dimension_semantics<arbitrary>], iteration_bounds = array<i64: 1, 1>, scalar_prefetch = 0 : i64, scratch_operands = 1 : i64, tpu.core_type = #tpu.core_type<tc>, window_params = [{transform_indices = @transform_0, window_bounds = array<i64: 256, 128>}, {transform_indices = @transform_1, window_bounds = array<i64: 128, 512>}, {transform_indices = @transform_2, window_bounds = array<i64: 1, 512>}, {transform_indices = @transform_3, window_bounds = array<i64: 512, 128>}, {pipeline_mode = #tpu.pipeline_mode<synchronous>, transform_indices = @transform_4, window_bounds = array<i64: 1, 128>}, {transform_indices = @transform_5, window_bounds = array<i64: 256, 128>}]} {
    %c0_i32 = arith.constant 0 : i32
    %0 = arith.cmpi eq, %arg1, %c0_i32 : i32
    %1 = arith.extui %0 : i1 to i32
    %c0_i32_0 = arith.constant 0 : i32
    %2 = arith.cmpi ne, %1, %c0_i32_0 : i32
    scf.if %2 {
      %cst_16 = arith.constant 0.000000e+00 : f32
      %20 = vector.broadcast %cst_16 : f32 to vector<256x128xf32>
      %c0_17 = arith.constant 0 : index
      %c0_18 = arith.constant 0 : index
      %21 = vector.load %arg6[%c0_17, %c0_18] : memref<1x128xf32, #tpu.memory_space<vmem>>, vector<1x128xf32>
      %22 = vector.broadcast %21 : vector<1x128xf32> to vector<256x128xf32>
      %23 = arith.addf %20, %22 : vector<256x128xf32>
      %c0_19 = arith.constant 0 : index
      %c0_20 = arith.constant 0 : index
      %24 = vector.load %arg8[%c0_19, %c0_20] : memref<256x128xf32, #tpu.memory_space<vmem>>, vector<256x128xf32>
      tpu.vector_store %arg8[%c0_19, %c0_20], %23 {strides = array<i32>} : memref<256x128xf32, #tpu.memory_space<vmem>>, vector<256x128xf32>,
    } else {
    }
    %c0 = arith.constant 0 : index
    %c0_1 = arith.constant 0 : index
    %3 = vector.load %arg2[%c0, %c0_1] : memref<256x128xbf16, #tpu.memory_space<vmem>>, vector<256x128xbf16>
    %c0_2 = arith.constant 0 : index
    %c0_3 = arith.constant 0 : index
    %4 = vector.load %arg3[%c0_2, %c0_3] : memref<128x512xbf16, #tpu.memory_space<vmem>>, vector<128x512xbf16>
    %cst = arith.constant dense<0.000000e+00> : vector<256x512xf32>
    %5 = tpu.matmul %3, %4, %cst {dimension_numbers = #tpu.dot_dimension_numbers<[1], [0], [0], [1], [0, 0, 1, 1], [], []>} : vector<256x128xbf16>, vector<128x512xbf16>, vector<256x512xf32> -> vector<256x512xf32>
    %c0_4 = arith.constant 0 : index
    %c0_5 = arith.constant 0 : index
    %6 = vector.load %arg4[%c0_4, %c0_5] : memref<1x512xf32, #tpu.memory_space<vmem>>, vector<1x512xf32>
    %7 = vector.broadcast %6 : vector<1x512xf32> to vector<256x512xf32>
    %8 = arith.addf %5, %7 : vector<256x512xf32>
    %cst_6 = arith.constant 0.000000e+00 : f32
    %9 = vector.broadcast %cst_6 : f32 to vector<256x512xf32>
    %10 = arith.maximumf %8, %9 : vector<256x512xf32>
    %c0_7 = arith.constant 0 : index
    %c0_8 = arith.constant 0 : index
    %11 = vector.load %arg8[%c0_7, %c0_8] : memref<256x128xf32, #tpu.memory_space<vmem>>, vector<256x128xf32>
    %12 = arith.truncf %10 : vector<256x512xf32> to vector<256x512xbf16>
    %c0_9 = arith.constant 0 : index
    %c0_10 = arith.constant 0 : index
    %13 = vector.load %arg5[%c0_9, %c0_10] : memref<512x128xbf16, #tpu.memory_space<vmem>>, vector<512x128xbf16>
    %cst_11 = arith.constant dense<0.000000e+00> : vector<256x128xf32>
    %14 = tpu.matmul %12, %13, %cst_11 {dimension_numbers = #tpu.dot_dimension_numbers<[1], [0], [0], [1], [0, 0, 1, 1], [], []>} : vector<256x512xbf16>, vector<512x128xbf16>, vector<256x128xf32> -> vector<256x128xf32>
    %15 = arith.addf %11, %14 : vector<256x128xf32>
    %c0_12 = arith.constant 0 : index
    %c0_13 = arith.constant 0 : index
    %16 = vector.load %arg8[%c0_12, %c0_13] : memref<256x128xf32, #tpu.memory_space<vmem>>, vector<256x128xf32>
    tpu.vector_store %arg8[%c0_12, %c0_13], %15 {strides = array<i32>} : memref<256x128xf32, #tpu.memory_space<vmem>>, vector<256x128xf32>,
    %c0_i32_14 = arith.constant 0 : i32
    %17 = arith.cmpi eq, %arg1, %c0_i32_14 : i32
    %18 = arith.extui %17 : i1 to i32
    %c0_i32_15 = arith.constant 0 : i32
    %19 = arith.cmpi ne, %18, %c0_i32_15 : i32
    scf.if %19 {
      %c0_16 = arith.constant 0 : index
      %c0_17 = arith.constant 0 : index
      %20 = vector.load %arg8[%c0_16, %c0_17] : memref<256x128xf32, #tpu.memory_space<vmem>>, vector<256x128xf32>
      %c0_18 = arith.constant 0 : index
      %c0_19 = arith.constant 0 : index
      %21 = vector.load %arg7[%c0_18, %c0_19] : memref<256x128xf32, #tpu.memory_space<vmem>>, vector<256x128xf32>
      tpu.vector_store %arg7[%c0_18, %c0_19], %20 {strides = array<i32>} : memref<256x128xf32, #tpu.memory_space<vmem>>, vector<256x128xf32>,
    } else {
    }
    return
  }
  func.func @transform_0(%arg0: i32, %arg1: i32) -> (i32, i32) {
    %c0_i32 = arith.constant 0 : i32
    %c0_i32_0 = arith.constant 0 : i32
    return %arg0, %c0_i32 : i32, i32
  }
  func.func @transform_1(%arg0: i32, %arg1: i32) -> (i32, i32) {
    %c0_i32 = arith.constant 0 : i32
    %c0_i32_0 = arith.constant 0 : i32
    return %c0_i32, %arg1 : i32, i32
  }
  func.func @transform_2(%arg0: i32, %arg1: i32) -> (i32, i32) {
    %c0_i32 = arith.constant 0 : i32
    %c0_i32_0 = arith.constant 0 : i32
    return %c0_i32, %arg1 : i32, i32
  }
  func.func @transform_3(%arg0: i32, %arg1: i32) -> (i32, i32) {
    %c0_i32 = arith.constant 0 : i32
    %c0_i32_0 = arith.constant 0 : i32
    return %arg1, %c0_i32 : i32, i32
  }
  func.func @transform_4(%arg0: i32, %arg1: i32) -> (i32, i32) {
    %c0_i32 = arith.constant 0 : i32
    %c0_i32_0 = arith.constant 0 : i32
    %c0_i32_1 = arith.constant 0 : i32
    return %c0_i32, %c0_i32_0 : i32, i32
  }
  func.func @transform_5(%arg0: i32, %arg1: i32) -> (i32, i32) {
    %c0_i32 = arith.constant 0 : i32
    %c0_i32_0 = arith.constant 0 : i32
    return %arg0, %c0_i32 : i32, i32
  }
}

</mosaic_0001>

<bundles_post_ra>
// kernel: mlp_forward.1
= control target key start
LH: loop header
LB: loop body
LE: loop exit
PB: predicated region body
PF: predicated region fallthrough
CT: control target
= control target key end

     0   :  { %10 = vsyncpa [#allocation4], 0  ;;  %s2172_s18 = smov [#allocation3]   ;;  %s2657_s0 = inlined_call_operand.vmem [shape: bf16[256,128], index: 0, kind: input, shape index: {}]   ;;  %s2658_s1 = inlined_call_operand.vmem [shape: bf16[128,512], index: 1, kind: input, shape index: {}]   ;;  %s2659_s2 = inlined_call_operand.vmem [shape: f32[1,512], index: 2, kind: input, shape index: {}]   ;;  %s2660_s3 = inlined_call_operand.hbm [shape: bf16[512,128], index: 3, kind: input, shape index: {}]   ;;  %s2661_s4 = inlined_call_operand.vmem [shape: f32[1,128], index: 4, kind: input, shape index: {}]   ;;  %s2662_s5 = inlined_call_operand.vmem [shape: f32[256,128], index: 5, kind: output, shape index: {}]  }
   0x1   :  { %s22_s19 = sshll.u32 %s2172_s18, 4  ;;  %s23_s19 = int_to_ptr.vmem [resolvable:$true] %s22_s19 }
   0x2   :  { %s2158_s20 = scalar_lea.vmem %s23_s19, 4096  ;;  %p2163_p1 = scmp.lt.s32.totalorder %s23_s19, %s23_s19 }
   0x3   :  { %p2159_p0 = scmp.ne.s32.totalorder %s23_s19, %s2158_s20  ;;  %p2164_p2 = scmp.lt.s32.totalorder %s2158_s20, %s2158_s20 }
   0x5   :  { %p2165_p3 = por %p2164_p2, %p2163_p1 }
   0x7   :  { %p2166_p4 = pnand %p2165_p3, %p2159_p0 }
   0x9   :  { %2169 = shalt.err (!%p2166_p4)
}
   0xa   :  { %s2173_s21 = smov 64   ;;  %s2174_s22 = smov 4  }
   0xb   :  { %28 = dma.hbm_to_vmem [thread:$0]  %s2660_s3, 4096, %s23_s19, [#allocation4], %s2173_s21, %s2173_s21, %s2174_s22  }
   0xc   :  { %2170 = dma.done.wait [#allocation4], 4096  }
   0xd   :  { %2171 = vsyncadd [#allocation4], 4294963200  ;;  %v2175_v0 = vmov 0   ;;  %v2054_v1 = vld [vmem:[%s2658_s1 + $0xe4] ss:$16 sps:$4 sm:$0xff]   ;;  %v2112_v34 = vld [vmem:[#allocation3 + $0x78] sm:$0xff]  }
   0xe   :  { %453 = vmatprep.mubr.bf16.mxu0 %v2175_v0  ;;  %646 = vmatprep.mubr.bf16.mxu1 %v2175_v0  ;;  %v2056_v2 = vld [vmem:[%s2658_s1 + $0xec] ss:$16 sps:$4 sm:$0xff]   ;;  %v2058_v3 = vld [vmem:[%s2658_s1 + $0xe0] ss:$16 sps:$4 sm:$0xff]   ;;  %v2059_v4 = vld [vmem:[%s2658_s1 + $0xe8] ss:$16 sps:$4 sm:$0xff]  }
   0xf   :  { %421 = vmatprep.subr.bf16.mxu0 %v2054_v1  ;;  %614 = vmatprep.subr.bf16.mxu1 %v2056_v2  ;;  %v2060_v5 = vld [vmem:[%s2658_s1 + $0xc4] ss:$16 sps:$4 sm:$0xff]   ;;  %v2062_v6 = vld [vmem:[%s2658_s1 + $0xcc] ss:$16 sps:$4 sm:$0xff]   ;;  %v2064_v7 = vld [vmem:[%s2658_s1 + $0xc0] ss:$16 sps:$4 sm:$0xff]  }
  0x10   :  { %422 = vmatpush1.bf16.msra.mxu0 %v2058_v3  ;;  %615 = vmatpush1.bf16.msra.mxu1 %v2059_v4  ;;  %v2065_v8 = vld [vmem:[%s2658_s1 + $0xc8] ss:$16 sps:$4 sm:$0xff]   ;;  %v2066_v9 = vld [vmem:[%s2658_s1 + $0xa4] ss:$16 sps:$4 sm:$0xff]   ;;  %v2068_v10 = vld [vmem:[%s2658_s1 + $0xac] ss:$16 sps:$4 sm:$0xff]  }
  0x11   :  { %423 = vmatprep.subr.bf16.mxu0 %v2060_v5  ;;  %616 = vmatprep.subr.bf16.mxu1 %v2062_v6  ;;  %v2070_v11 = vld [vmem:[%s2658_s1 + $0xa0] ss:$16 sps:$4 sm:$0xff]   ;;  %v2071_v12 = vld [vmem:[%s2658_s1 + $0xa8] ss:$16 sps:$4 sm:$0xff]   ;;  %v2072_v13 = vld [vmem:[%s2658_s1 + $0x84] ss:$16 sps:$4 sm:$0xff]  }
  0x12   :  { %v2074_v14 = vld [vmem:[%s2658_s1 + $0x8c] ss:$16 sps:$4 sm:$0xff]   ;;  %v2076_v15 = vld [vmem:[%s2658_s1 + $0x80] ss:$16 sps:$4 sm:$0xff]   ;;  %v2077_v16 = vld [vmem:[%s2658_s1 + $0x88] ss:$16 sps:$4 sm:$0xff]  }
  0x13   :  { %v2078_v17 = vld [vmem:[%s2658_s1 + $0x64] ss:$16 sps:$4 sm:$0xff]   ;;  %v2080_v18 = vld [vmem:[%s2658_s1 + $0x6c] ss:$16 sps:$4 sm:$0xff]   ;;  %v2082_v19 = vld [vmem:[%s2658_s1 + $0x60] ss:$16 sps:$4 sm:$0xff]  }
  0x14   :  { %424 = vmatpush1.bf16.msra.mxu0 %v2064_v7  ;;  %617 = vmatpush1.bf16.msra.mxu1 %v2065_v8  ;;  %v2083_v20 = vld [vmem:[%s2658_s1 + $0x68] ss:$16 sps:$4 sm:$0xff]   ;;  %v2084_v21 = vld [vmem:[%s2658_s1 + $0x44] ss:$16 sps:$4 sm:$0xff]   ;;  %v2086_v22 = vld [vmem:[%s2658_s1 + $0x4c] ss:$16 sps:$4 sm:$0xff]  }
  0x15   :  { %425 = vmatprep.subr.bf16.mxu0 %v2066_v9  ;;  %618 = vmatprep.subr.bf16.mxu1 %v2068_v10  ;;  %v2088_v23 = vld [vmem:[%s2658_s1 + $0x40] ss:$16 sps:$4 sm:$0xff]   ;;  %v2089_v24 = vld [vmem:[%s2658_s1 + $0x48] ss:$16 sps:$4 sm:$0xff]   ;;  %v2090_v25 = vld [vmem:[%s2658_s1 + $0x24] ss:$16 sps:$4 sm:$0xff]  }
  0x16   :  { %v2092_v26 = vld [vmem:[%s2658_s1 + $0x2c] ss:$16 sps:$4 sm:$0xff]   ;;  %v2094_v27 = vld [vmem:[%s2658_s1 + $0x20] ss:$16 sps:$4 sm:$0xff]   ;;  %v2095_v28 = vld [vmem:[%s2658_s1 + $0x28] ss:$16 sps:$4 sm:$0xff]  }
  0x17   :  { %v2096_v29 = vld [vmem:[%s2658_s1 + $0x4] ss:$16 sps:$4 sm:$0xff]   ;;  %v2098_v30 = vld [vmem:[%s2658_s1 + $0xc] ss:$16 sps:$4 sm:$0xff]   ;;  %v2100_v31 = vld [vmem:[%s2658_s1] ss:$16 sps:$4 sm:$0xff]  }
  0x18   :  { %426 = vmatpush1.bf16.msra.mxu0 %v2070_v11  ;;  %619 = vmatpush1.bf16.msra.mxu1 %v2071_v12  ;;  %v2101_v32 = vld [vmem:[%s2658_s1 + $0x8] ss:$16 sps:$4 sm:$0xff]   ;;  %v2102_v33 = vld [vmem:[%s2657_s0] sm:$0xff]   ;;  %v2118_v39 = vld [vmem:[#allocation3 + $0x70] sm:$0xff]  }
  0x19   :  { %427 = vmatprep.subr.bf16.mxu0 %v2072_v13  ;;  %620 = vmatprep.subr.bf16.mxu1 %v2074_v14  ;;  %v2113_v35 = vld [vmem:[#allocation3 + $0xf8] sm:$0xff]   ;;  %v2103_v38 = vld [vmem:[%s2657_s0 + $0x8] sm:$0xff]   ;;  %v2119_v40 = vld [vmem:[#allocation3 + $0xf0] sm:$0xff]  }
  0x1a   :  { %v2114_v36 = vld [vmem:[#allocation3 + $0x38] sm:$0xff]   ;;  %v2120_v41 = vld [vmem:[#allocation3 + $0x30] sm:$0xff]   ;;  %v2124_v43 = vld [vmem:[#allocation3 + $0x68] sm:$0xff]  }
  0x1b   :  { %v2115_v37 = vld [vmem:[#allocation3 + $0xb8] sm:$0xff]   ;;  %v2121_v42 = vld [vmem:[#allocation3 + $0xb0] sm:$0xff]   ;;  %v2125_v45 = vld [vmem:[#allocation3 + $0xe8] sm:$0xff]  }
  0x1c   :  { %428 = vmatpush1.bf16.msra.mxu0 %v2076_v15  ;;  %621 = vmatpush1.bf16.msra.mxu1 %v2077_v16  ;;  %v2104_v44 = vld [vmem:[%s2657_s0 + $0x10] sm:$0xff]   ;;  %v2126_v46 = vld [vmem:[#allocation3 + $0x28] sm:$0xff]   ;;  %v2130_v48 = vld [vmem:[#allocation3 + $0x60] sm:$0xff]  }
  0x1d   :  { %429 = vmatprep.subr.bf16.mxu0 %v2078_v17  ;;  %622 = vmatprep.subr.bf16.mxu1 %v2080_v18  ;;  %v2127_v47 = vld [vmem:[#allocation3 + $0xa8] sm:$0xff]   ;;  %v2131_v49 = vld [vmem:[#allocation3 + $0xe0] sm:$0xff]   ;;  %v2105_v51 = vld [vmem:[%s2657_s0 + $0x18] sm:$0xff]   ;;  %v145_v18 = vlaneseq }
  0x1e   :  { %v2132_v50 = vld [vmem:[#allocation3 + $0x20] sm:$0xff]   ;;  %v2134_v53 = vld [vmem:[#allocation3 + $0x58] sm:$0xff]   ;;  %v2138_v57 = vld [vmem:[#allocation3 + $0x50] sm:$0xff]  }
  0x1f   :  { %v2133_v52 = vld [vmem:[#allocation3 + $0xa0] sm:$0xff]   ;;  %v2135_v54 = vld [vmem:[#allocation3 + $0xd8] sm:$0xff]   ;;  %v2139_v58 = vld [vmem:[#allocation3 + $0xd0] sm:$0xff]  }
  0x20   :  { %430 = vmatpush1.bf16.msra.mxu0 %v2082_v19  ;;  %623 = vmatpush1.bf16.msra.mxu1 %v2083_v20  ;;  %v2136_v55 = vld [vmem:[#allocation3 + $0x18] sm:$0xff]   ;;  %v2140_v59 = vld [vmem:[#allocation3 + $0x10] sm:$0xff]   ;;  %v2106_v60 = vld [vmem:[%s2657_s0 + $0x20] sm:$0xff]   ;;  %v146_v19 = vshrl.u32 %v145_v18, 7 }
  0x21   :  { %431 = vmatprep.subr.bf16.mxu0 %v2084_v21  ;;  %624 = vmatprep.subr.bf16.mxu1 %v2086_v22  ;;  %v2137_v56 = vld [vmem:[#allocation3 + $0x98] sm:$0xff]   ;;  %v2141_v61 = vld [vmem:[#allocation3 + $0x90] sm:$0xff]   ;;  %v2142_v62 = vld [vmem:[#allocation3 + $0x48] sm:$0xff]  }
  0x22   :  { %v2143_v63 = vld [vmem:[#allocation3 + $0xc8] sm:$0xff]   ;;  %v2146_v3 = vld [vmem:[#allocation3 + $0x40] sm:$0xff]   ;;  %v2108_v8 = vld [vmem:[%s2657_s0 + $0x30] sm:$0xff]   ;;  %v151_v20 = vsub.s32 1, %v146_v19  ;;  %v159_v21 = vsub.s32 3, %v146_v19  ;;  %v147_v22 = vsub.s32 0, %v146_v19 }
  0x23   :  { %v2144_v1 = vld [vmem:[#allocation3 + $0x8] sm:$0xff]   ;;  %v2147_v4 = vld [vmem:[#allocation3 + $0xc0] sm:$0xff]   ;;  %v2109_v9 = vld [vmem:[%s2657_s0 + $0x38] sm:$0xff]  }
  0x24   :  { %432 = vmatpush1.bf16.msra.mxu0 %v2088_v23  ;;  %625 = vmatpush1.bf16.msra.mxu1 %v2089_v24  ;;  %v2145_v2 = vld [vmem:[#allocation3 + $0x88] sm:$0xff]   ;;  %v2148_v5 = vld [vmem:[#allocation3] sm:$0xff]   ;;  %v2116_v12 = vld [vmem:[%s2657_s0 + $0x50] sm:$0xff]   ;;  %v155_v23 = vsub.s32 2, %v146_v19 }
  0x25   :  { %433 = vmatprep.subr.bf16.mxu0 %v2090_v25  ;;  %626 = vmatprep.subr.bf16.mxu1 %v2092_v26  ;;  %v2149_v6 = vld [vmem:[#allocation3 + $0x80] sm:$0xff]   ;;  %v2107_v7 = vld [vmem:[%s2657_s0 + $0x28] sm:$0xff]   ;;  %v2117_v13 = vld [vmem:[%s2657_s0 + $0x58] sm:$0xff]  }
  0x26   :  { %v2110_v10 = vld [vmem:[%s2657_s0 + $0x40] sm:$0xff]   ;;  %v2111_v11 = vld [vmem:[%s2657_s0 + $0x48] sm:$0xff]   ;;  %v2128_v16 = vld [vmem:[%s2657_s0 + $0x70] sm:$0xff]  }
  0x27   :  { %v2122_v14 = vld [vmem:[%s2657_s0 + $0x60] sm:$0xff]   ;;  %v2123_v15 = vld [vmem:[%s2657_s0 + $0x68] sm:$0xff]   ;;  %v2129_v17 = vld [vmem:[%s2657_s0 + $0x78] sm:$0xff]  }
  0x28   :  { %434 = vmatpush1.bf16.msra.mxu0 %v2094_v27  ;;  %627 = vmatpush1.bf16.msra.mxu1 %v2095_v28  ;;  %v143_v24 = vld [vmem:[%s2659_s2] sm:$0xf] }
  0x29   :  { %435 = vmatprep.subr.bf16.mxu0 %v2096_v29  ;;  %628 = vmatprep.subr.bf16.mxu1 %v2098_v30  ;;  %v2388_v27 = vrot.slane %v143_v24, %v151_v20  ;;  %v2392_v28 = vrot.slane %v143_v24, %v147_v22  ;;  %v2394_v29 = vrot.slane %v143_v24, %v155_v23 }
  0x2c   :  { %436 = vmatpush1.bf16.msra.mxu0 %v2100_v31  ;;  %629 = vmatpush1.bf16.msra.mxu1 %v2101_v32 }
  0x2d   :  { %1826 = vmatprep.subr.bf16.mxu0 %v2112_v34  ;;  %1938 = vmatprep.subr.bf16.mxu1 %v2113_v35 }
  0x2f   :  { %454 = vmatmul.mubr.bf16.vlgmr.msra.gmra.mxu0 %v2102_v33  ;;  %647 = vmatmul.mubr.bf16.vlgmr.msra.gmra.mxu1 %v2102_v33 }
  0x30   :  { %463 = vmatprep.mubr.bf16.mxu0 %v2175_v0  ;;  %656 = vmatprep.mubr.bf16.mxu1 %v2175_v0 }
  0x31   :  { %1827 = vmatpush3.bf16.msra.mxu0 %v2114_v36  ;;  %1939 = vmatpush3.bf16.msra.mxu1 %v2115_v37 }
  0x32   :  { %1828 = vmatprep.subr.bf16.mxu0 %v2118_v39  ;;  %1940 = vmatprep.subr.bf16.mxu1 %v2119_v40 }
  0x35   :  { %1829 = vmatpush3.bf16.msra.mxu0 %v2120_v41  ;;  %1941 = vmatpush3.bf16.msra.mxu1 %v2121_v42 }
  0x36   :  { %1830 = vmatprep.subr.bf16.mxu0 %v2124_v43  ;;  %1942 = vmatprep.subr.bf16.mxu1 %v2125_v45 }
  0x37   :  { %464 = vmatmul.mubr.bf16.gmra.mxu0 %v2103_v38  ;;  %657 = vmatmul.mubr.bf16.gmra.mxu1 %v2103_v38 }
  0x38   :  { %473 = vmatprep.mubr.bf16.mxu0 %v2175_v0  ;;  %666 = vmatprep.mubr.bf16.mxu1 %v2175_v0 }
  0x39   :  { %1831 = vmatpush3.bf16.msra.mxu0 %v2126_v46  ;;  %1943 = vmatpush3.bf16.msra.mxu1 %v2127_v47 }
  0x3a   :  { %1832 = vmatprep.subr.bf16.mxu0 %v2130_v48  ;;  %1944 = vmatprep.subr.bf16.mxu1 %v2131_v49 }
  0x3d   :  { %1833 = vmatpush3.bf16.msra.mxu0 %v2132_v50  ;;  %1945 = vmatpush3.bf16.msra.mxu1 %v2133_v52 }
  0x3e   :  { %1834 = vmatprep.subr.bf16.mxu0 %v2134_v53  ;;  %1946 = vmatprep.subr.bf16.mxu1 %v2135_v54 }
  0x3f   :  { %474 = vmatmul.mubr.bf16.gmra.mxu0 %v2104_v44  ;;  %667 = vmatmul.mubr.bf16.gmra.mxu1 %v2104_v44 }
  0x40   :  { %483 = vmatprep.mubr.bf16.mxu0 %v2175_v0  ;;  %676 = vmatprep.mubr.bf16.mxu1 %v2175_v0 }
  0x41   :  { %1835 = vmatpush3.bf16.msra.mxu0 %v2136_v55  ;;  %1947 = vmatpush3.bf16.msra.mxu1 %v2137_v56 }
  0x42   :  { %1836 = vmatprep.subr.bf16.mxu0 %v2138_v57  ;;  %1948 = vmatprep.subr.bf16.mxu1 %v2139_v58 }
  0x45   :  { %1837 = vmatpush3.bf16.msra.mxu0 %v2140_v59  ;;  %1949 = vmatpush3.bf16.msra.mxu1 %v2141_v61 }
  0x46   :  { %1838 = vmatprep.subr.bf16.mxu0 %v2142_v62  ;;  %1950 = vmatprep.subr.bf16.mxu1 %v2143_v63 }
  0x47   :  { %484 = vmatmul.mubr.bf16.gmra.mxu0 %v2105_v51  ;;  %677 = vmatmul.mubr.bf16.gmra.mxu1 %v2105_v51 }
  0x48   :  { %493 = vmatprep.mubr.bf16.mxu0 %v2175_v0  ;;  %686 = vmatprep.mubr.bf16.mxu1 %v2175_v0 }
  0x49   :  { %1839 = vmatpush3.bf16.msra.mxu0 %v2144_v1  ;;  %1951 = vmatpush3.bf16.msra.mxu1 %v2145_v2 }
  0x4a   :  { %1840 = vmatprep.subr.bf16.mxu0 %v2146_v3  ;;  %1952 = vmatprep.subr.bf16.mxu1 %v2147_v4 }
  0x4d   :  { %1841 = vmatpush3.bf16.msra.mxu0 %v2148_v5  ;;  %1953 = vmatpush3.bf16.msra.mxu1 %v2149_v6 }
  0x4f   :  { %494 = vmatmul.mubr.bf16.gmra.mxu0 %v2106_v60  ;;  %687 = vmatmul.mubr.bf16.gmra.mxu1 %v2106_v60 }
  0x50   :  { %503 = vmatprep.mubr.bf16.mxu0 %v2175_v0  ;;  %696 = vmatprep.mubr.bf16.mxu1 %v2175_v0 }
  0x57   :  { %504 = vmatmul.mubr.bf16.gmra.mxu0 %v2107_v7  ;;  %697 = vmatmul.mubr.bf16.gmra.mxu1 %v2107_v7 }
  0x58   :  { %513 = vmatprep.mubr.bf16.mxu0 %v2175_v0  ;;  %706 = vmatprep.mubr.bf16.mxu1 %v2175_v0 }
  0x5f   :  { %514 = vmatmul.mubr.bf16.gmra.mxu0 %v2108_v8  ;;  %707 = vmatmul.mubr.bf16.gmra.mxu1 %v2108_v8 }
  0x60   :  { %523 = vmatprep.mubr.bf16.mxu0 %v2175_v0  ;;  %716 = vmatprep.mubr.bf16.mxu1 %v2175_v0 }
  0x67   :  { %524 = vmatmul.mubr.bf16.gmra.mxu0 %v2109_v9  ;;  %717 = vmatmul.mubr.bf16.gmra.mxu1 %v2109_v9 }
  0x68   :  { %533 = vmatprep.mubr.bf16.mxu0 %v2175_v0  ;;  %726 = vmatprep.mubr.bf16.mxu1 %v2175_v0 }
  0x6f   :  { %534 = vmatmul.mubr.bf16.gmra.mxu0 %v2110_v10  ;;  %727 = vmatmul.mubr.bf16.gmra.mxu1 %v2110_v10 }
  0x70   :  { %543 = vmatprep.mubr.bf16.mxu0 %v2175_v0  ;;  %736 = vmatprep.mubr.bf16.mxu1 %v2175_v0 }
  0x77   :  { %544 = vmatmul.mubr.bf16.gmra.mxu0 %v2111_v11  ;;  %737 = vmatmul.mubr.bf16.gmra.mxu1 %v2111_v11 }
  0x78   :  { %553 = vmatprep.mubr.bf16.mxu0 %v2175_v0  ;;  %746 = vmatprep.mubr.bf16.mxu1 %v2175_v0 }
  0x7f   :  { %554 = vmatmul.mubr.bf16.gmra.mxu0 %v2116_v12  ;;  %747 = vmatmul.mubr.bf16.gmra.mxu1 %v2116_v12 }
  0x80   :  { %563 = vmatprep.mubr.bf16.mxu0 %v2175_v0  ;;  %756 = vmatprep.mubr.bf16.mxu1 %v2175_v0 }
  0x87   :  { %564 = vmatmul.mubr.bf16.gmra.mxu0 %v2117_v13  ;;  %757 = vmatmul.mubr.bf16.gmra.mxu1 %v2117_v13 }
  0x88   :  { %573 = vmatprep.mubr.bf16.mxu0 %v2175_v0  ;;  %766 = vmatprep.mubr.bf16.mxu1 %v2175_v0 }
  0x8f   :  { %574 = vmatmul.mubr.bf16.gmra.mxu0 %v2122_v14  ;;  %767 = vmatmul.mubr.bf16.gmra.mxu1 %v2122_v14 }
  0x90   :  { %583 = vmatprep.mubr.bf16.mxu0 %v2175_v0  ;;  %776 = vmatprep.mubr.bf16.mxu1 %v2175_v0 }
  0x97   :  { %584 = vmatmul.mubr.bf16.gmra.mxu0 %v2123_v15  ;;  %777 = vmatmul.mubr.bf16.gmra.mxu1 %v2123_v15 }
  0x98   :  { %593 = vmatprep.mubr.bf16.mxu0 %v2175_v0  ;;  %786 = vmatprep.mubr.bf16.mxu1 %v2175_v0 }
  0x9f   :  { %594 = vmatmul.mubr.bf16.gmra.mxu0 %v2128_v16  ;;  %787 = vmatmul.mubr.bf16.gmra.mxu1 %v2128_v16 }
  0xa0   :  { %603 = vmatprep.mubr.bf16.mxu0 %v2175_v0  ;;  %796 = vmatprep.mubr.bf16.mxu1 %v2175_v0  ;;  %v2390_v0 = vrot.slane %v143_v24, %v159_v21 }
  0xa7   :  { %604 = vmatmul.mubr.bf16.gmra.mxu0 %v2129_v17  ;;  %797 = vmatmul.mubr.bf16.gmra.mxu1 %v2129_v17 }
  0xef   :  { %v455_v25 = vpop.f32.mrf.mxu0  ;;  %v648_v26 = vpop.f32.mrf.mxu1 }
  0xf0   :  { %v456_v38 = vadd.f32 %v455_v25, %v2392_v28  ;;  %v649_v39 = vadd.f32 %v648_v26, %v2394_v29 }
  0xf1   :  { %v457_v30 = vpop.f32.mrf.mxu0  ;;  %v650_v31 = vpop.f32.mrf.mxu1 }
  0xf2   :  { %v458_v34 = vadd.f32 %v457_v30, %v2388_v27  ;;  %v651_v35 = vadd.f32 %v650_v31, %v2390_v0  ;;  %v807_v52 = vmax.f32 %v456_v38, 0.0  ;;  %v809_v53 = vmax.f32 %v649_v39, 0.0 }
  0xf3   :  { %v459_v32 = vpop.f32.mrf.mxu0  ;;  %v652_v33 = vpop.f32.mrf.mxu1 }
  0xf4   :  { %v460_v36 = vadd.f32 %v459_v32, %v2392_v28  ;;  %v653_v37 = vadd.f32 %v652_v33, %v2394_v29  ;;  %v808_v48 = vmax.f32 %v458_v34, 0.0  ;;  %v810_v49 = vmax.f32 %v651_v35, 0.0 }
  0xf5   :  { %v461_v40 = vpop.f32.mrf.mxu0  ;;  %v654_v41 = vpop.f32.mrf.mxu1 }
  0xf6   :  { %v462_v42 = vadd.f32 %v461_v40, %v2388_v27  ;;  %v655_v43 = vadd.f32 %v654_v41, %v2390_v0  ;;  %v811_v44 = vmax.f32 %v460_v36, 0.0  ;;  %v813_v45 = vmax.f32 %v653_v37, 0.0 }
  0xf7   :  { %v465_v46 = vpop.f32.mrf.mxu0  ;;  %v658_v47 = vpop.f32.mrf.mxu1 }
  0xf8   :  { %v812_v50 = vmax.f32 %v462_v42, 0.0  ;;  %v814_v51 = vmax.f32 %v655_v43, 0.0  ;;  %v967_v58 = vpack.c.bf16 %v811_v44, %v807_v52  ;;  %v969_v59 = vpack.c.bf16 %v813_v45, %v809_v53 }
  0xf9   :  { %v467_v54 = vpop.f32.mrf.mxu0  ;;  %v660_v55 = vpop.f32.mrf.mxu1  ;;  %v466_v3 = vadd.f32 %v465_v46, %v2392_v28  ;;  %v659_v4 = vadd.f32 %v658_v47, %v2394_v29 }
  0xfa   :  { %v968_v56 = vpack.c.bf16 %v812_v50, %v808_v48  ;;  %v970_v57 = vpack.c.bf16 %v814_v51, %v810_v49  ;;  %v468_v60 = vadd.f32 %v467_v54, %v2388_v27  ;;  %v661_v63 = vadd.f32 %v660_v55, %v2390_v0 }
  0xfb   :  { %v469_v61 = vpop.f32.mrf.mxu0  ;;  %v662_v62 = vpop.f32.mrf.mxu1  ;;  %v815_v17 = vmax.f32 %v466_v3, 0.0  ;;  %v817_v18 = vmax.f32 %v659_v4, 0.0 }
  0xfc   :  { %v470_v1 = vadd.f32 %v469_v61, %v2392_v28  ;;  %v663_v2 = vadd.f32 %v662_v62, %v2394_v29  ;;  %1319 = vmatprep.mubr.bf16.mxu0 %v968_v56  ;;  %1480 = vmatprep.mubr.bf16.mxu1 %v970_v57  ;;  %v816_v13 = vmax.f32 %v468_v60, 0.0  ;;  %v818_v14 = vmax.f32 %v661_v63, 0.0 }
  0xfd   :  { %v471_v5 = vpop.f32.mrf.mxu0  ;;  %v664_v6 = vpop.f32.mrf.mxu1  ;;  %1320 = vmatmul.mubr.bf16.vlgmr.msra.gmra.mxu0 %v967_v58  ;;  %1481 = vmatmul.mubr.bf16.vlgmr.msra.gmra.mxu1 %v969_v59 }
  0xfe   :  { %v472_v7 = vadd.f32 %v471_v5, %v2388_v27  ;;  %v665_v8 = vadd.f32 %v664_v6, %v2390_v0  ;;  %v819_v9 = vmax.f32 %v470_v1, 0.0  ;;  %v821_v10 = vmax.f32 %v663_v2, 0.0 }
  0xff   :  { %v475_v11 = vpop.f32.mrf.mxu0  ;;  %v668_v12 = vpop.f32.mrf.mxu1 }
 0x100   :  { %v820_v15 = vmax.f32 %v472_v7, 0.0  ;;  %v822_v16 = vmax.f32 %v665_v8, 0.0  ;;  %v971_v23 = vpack.c.bf16 %v819_v9, %v815_v17  ;;  %v973_v24 = vpack.c.bf16 %v821_v10, %v817_v18 }
 0x101   :  { %v477_v19 = vpop.f32.mrf.mxu0  ;;  %v670_v20 = vpop.f32.mrf.mxu1  ;;  %v476_v34 = vadd.f32 %v475_v11, %v2392_v28  ;;  %v669_v35 = vadd.f32 %v668_v12, %v2394_v29 }
 0x102   :  { %v972_v21 = vpack.c.bf16 %v820_v15, %v816_v13  ;;  %v974_v22 = vpack.c.bf16 %v822_v16, %v818_v14  ;;  %v478_v25 = vadd.f32 %v477_v19, %v2388_v27  ;;  %v671_v31 = vadd.f32 %v670_v20, %v2390_v0 }
 0x103   :  { %v479_v26 = vpop.f32.mrf.mxu0  ;;  %v672_v30 = vpop.f32.mrf.mxu1  ;;  %v823_v48 = vmax.f32 %v476_v34, 0.0  ;;  %v825_v49 = vmax.f32 %v669_v35, 0.0 }
 0x104   :  { %v480_v32 = vadd.f32 %v479_v26, %v2392_v28  ;;  %v673_v33 = vadd.f32 %v672_v30, %v2394_v29  ;;  %1327 = vmatprep.mubr.bf16.mxu0 %v972_v21  ;;  %1488 = vmatprep.mubr.bf16.mxu1 %v974_v22  ;;  %v824_v44 = vmax.f32 %v478_v25, 0.0  ;;  %v826_v45 = vmax.f32 %v671_v31, 0.0 }
 0x105   :  { %v481_v36 = vpop.f32.mrf.mxu0  ;;  %v674_v37 = vpop.f32.mrf.mxu1  ;;  %1328 = vmatmul.mubr.bf16.gmra.mxu0 %v971_v23  ;;  %1489 = vmatmul.mubr.bf16.gmra.mxu1 %v973_v24 }
 0x106   :  { %v482_v38 = vadd.f32 %v481_v36, %v2388_v27  ;;  %v675_v39 = vadd.f32 %v674_v37, %v2390_v0  ;;  %v827_v40 = vmax.f32 %v480_v32, 0.0  ;;  %v829_v41 = vmax.f32 %v673_v33, 0.0 }
 0x107   :  { %v485_v42 = vpop.f32.mrf.mxu0  ;;  %v678_v43 = vpop.f32.mrf.mxu1 }
 0x108   :  { %v828_v46 = vmax.f32 %v482_v38, 0.0  ;;  %v830_v47 = vmax.f32 %v675_v39, 0.0  ;;  %v975_v54 = vpack.c.bf16 %v827_v40, %v823_v48  ;;  %v977_v55 = vpack.c.bf16 %v829_v41, %v825_v49 }
 0x109   :  { %v487_v50 = vpop.f32.mrf.mxu0  ;;  %v680_v51 = vpop.f32.mrf.mxu1  ;;  %v486_v62 = vadd.f32 %v485_v42, %v2392_v28  ;;  %v679_v63 = vadd.f32 %v678_v43, %v2394_v29 }
 0x10a   :  { %v976_v52 = vpack.c.bf16 %v828_v46, %v824_v44  ;;  %v978_v53 = vpack.c.bf16 %v830_v47, %v826_v45  ;;  %v488_v56 = vadd.f32 %v487_v50, %v2388_v27  ;;  %v681_v59 = vadd.f32 %v680_v51, %v2390_v0 }
 0x10b   :  { %v489_v57 = vpop.f32.mrf.mxu0  ;;  %v682_v58 = vpop.f32.mrf.mxu1  ;;  %v831_v13 = vmax.f32 %v486_v62, 0.0  ;;  %v833_v14 = vmax.f32 %v679_v63, 0.0 }
 0x10c   :  { %v490_v60 = vadd.f32 %v489_v57, %v2392_v28  ;;  %v683_v61 = vadd.f32 %v682_v58, %v2394_v29  ;;  %1335 = vmatprep.mubr.bf16.mxu0 %v976_v52  ;;  %1496 = vmatprep.mubr.bf16.mxu1 %v978_v53  ;;  %v832_v9 = vmax.f32 %v488_v56, 0.0  ;;  %v834_v10 = vmax.f32 %v681_v59, 0.0 }
 0x10d   :  { %v491_v1 = vpop.f32.mrf.mxu0  ;;  %v684_v2 = vpop.f32.mrf.mxu1  ;;  %1336 = vmatmul.mubr.bf16.gmra.mxu0 %v975_v54  ;;  %1497 = vmatmul.mubr.bf16.gmra.mxu1 %v977_v55 }
 0x10e   :  { %v492_v3 = vadd.f32 %v491_v1, %v2388_v27  ;;  %v685_v4 = vadd.f32 %v684_v2, %v2390_v0  ;;  %v835_v5 = vmax.f32 %v490_v60, 0.0  ;;  %v837_v6 = vmax.f32 %v683_v61, 0.0 }
 0x10f   :  { %v495_v7 = vpop.f32.mrf.mxu0  ;;  %v688_v8 = vpop.f32.mrf.mxu1 }
 0x110   :  { %v836_v11 = vmax.f32 %v492_v3, 0.0  ;;  %v838_v12 = vmax.f32 %v685_v4, 0.0  ;;  %v979_v19 = vpack.c.bf16 %v835_v5, %v831_v13  ;;  %v981_v20 = vpack.c.bf16 %v837_v6, %v833_v14 }
 0x111   :  { %v497_v15 = vpop.f32.mrf.mxu0  ;;  %v690_v16 = vpop.f32.mrf.mxu1  ;;  %v496_v30 = vadd.f32 %v495_v7, %v2392_v28  ;;  %v689_v31 = vadd.f32 %v688_v8, %v2394_v29 }
 0x112   :  { %v980_v17 = vpack.c.bf16 %v836_v11, %v832_v9  ;;  %v982_v18 = vpack.c.bf16 %v838_v12, %v834_v10  ;;  %v498_v21 = vadd.f32 %v497_v15, %v2388_v27  ;;  %v691_v24 = vadd.f32 %v690_v16, %v2390_v0 }
 0x113   :  { %v499_v22 = vpop.f32.mrf.mxu0  ;;  %v692_v23 = vpop.f32.mrf.mxu1  ;;  %v839_v44 = vmax.f32 %v496_v30, 0.0  ;;  %v841_v45 = vmax.f32 %v689_v31, 0.0 }
 0x114   :  { %v500_v25 = vadd.f32 %v499_v22, %v2392_v28  ;;  %v693_v26 = vadd.f32 %v692_v23, %v2394_v29  ;;  %1343 = vmatprep.mubr.bf16.mxu0 %v980_v17  ;;  %1504 = vmatprep.mubr.bf16.mxu1 %v982_v18  ;;  %v840_v40 = vmax.f32 %v498_v21, 0.0  ;;  %v842_v41 = vmax.f32 %v691_v24, 0.0 }
 0x115   :  { %v501_v32 = vpop.f32.mrf.mxu0  ;;  %v694_v33 = vpop.f32.mrf.mxu1  ;;  %1344 = vmatmul.mubr.bf16.gmra.mxu0 %v979_v19  ;;  %1505 = vmatmul.mubr.bf16.gmra.mxu1 %v981_v20 }
 0x116   :  { %v502_v34 = vadd.f32 %v501_v32, %v2388_v27  ;;  %v695_v35 = vadd.f32 %v694_v33, %v2390_v0  ;;  %v843_v36 = vmax.f32 %v500_v25, 0.0  ;;  %v845_v37 = vmax.f32 %v693_v26, 0.0 }
 0x117   :  { %v505_v38 = vpop.f32.mrf.mxu0  ;;  %v698_v39 = vpop.f32.mrf.mxu1 }
 0x118   :  { %v844_v42 = vmax.f32 %v502_v34, 0.0  ;;  %v846_v43 = vmax.f32 %v695_v35, 0.0  ;;  %v983_v50 = vpack.c.bf16 %v843_v36, %v839_v44  ;;  %v985_v51 = vpack.c.bf16 %v845_v37, %v841_v45 }
 0x119   :  { %v507_v46 = vpop.f32.mrf.mxu0  ;;  %v700_v47 = vpop.f32.mrf.mxu1  ;;  %v506_v58 = vadd.f32 %v505_v38, %v2392_v28  ;;  %v699_v59 = vadd.f32 %v698_v39, %v2394_v29 }
 0x11a   :  { %v984_v48 = vpack.c.bf16 %v844_v42, %v840_v40  ;;  %v986_v49 = vpack.c.bf16 %v846_v43, %v842_v41  ;;  %v508_v52 = vadd.f32 %v507_v46, %v2388_v27  ;;  %v701_v55 = vadd.f32 %v700_v47, %v2390_v0 }
 0x11b   :  { %v509_v53 = vpop.f32.mrf.mxu0  ;;  %v702_v54 = vpop.f32.mrf.mxu1  ;;  %v847_v9 = vmax.f32 %v506_v58, 0.0  ;;  %v849_v10 = vmax.f32 %v699_v59, 0.0 }
 0x11c   :  { %v510_v56 = vadd.f32 %v509_v53, %v2392_v28  ;;  %v703_v57 = vadd.f32 %v702_v54, %v2394_v29  ;;  %1351 = vmatprep.mubr.bf16.mxu0 %v984_v48  ;;  %1512 = vmatprep.mubr.bf16.mxu1 %v986_v49  ;;  %v848_v5 = vmax.f32 %v508_v52, 0.0  ;;  %v850_v6 = vmax.f32 %v701_v55, 0.0 }
 0x11d   :  { %v511_v60 = vpop.f32.mrf.mxu0  ;;  %v704_v61 = vpop.f32.mrf.mxu1  ;;  %1352 = vmatmul.mubr.bf16.gmra.mxu0 %v983_v50  ;;  %1513 = vmatmul.mubr.bf16.gmra.mxu1 %v985_v51 }
 0x11e   :  { %v512_v62 = vadd.f32 %v511_v60, %v2388_v27  ;;  %v705_v63 = vadd.f32 %v704_v61, %v2390_v0  ;;  %v851_v1 = vmax.f32 %v510_v56, 0.0  ;;  %v853_v2 = vmax.f32 %v703_v57, 0.0 }
 0x11f   :  { %v515_v3 = vpop.f32.mrf.mxu0  ;;  %v708_v4 = vpop.f32.mrf.mxu1 }
 0x120   :  { %v852_v7 = vmax.f32 %v512_v62, 0.0  ;;  %v854_v8 = vmax.f32 %v705_v63, 0.0  ;;  %v987_v15 = vpack.c.bf16 %v851_v1, %v847_v9  ;;  %v989_v16 = vpack.c.bf16 %v853_v2, %v849_v10 }
 0x121   :  { %v517_v11 = vpop.f32.mrf.mxu0  ;;  %v710_v12 = vpop.f32.mrf.mxu1  ;;  %v516_v23 = vadd.f32 %v515_v3, %v2392_v28  ;;  %v709_v24 = vadd.f32 %v708_v4, %v2394_v29 }
 0x122   :  { %v988_v13 = vpack.c.bf16 %v852_v7, %v848_v5  ;;  %v990_v14 = vpack.c.bf16 %v854_v8, %v850_v6  ;;  %v518_v17 = vadd.f32 %v517_v11, %v2388_v27  ;;  %v711_v20 = vadd.f32 %v710_v12, %v2390_v0 }
 0x123   :  { %v519_v18 = vpop.f32.mrf.mxu0  ;;  %v712_v19 = vpop.f32.mrf.mxu1  ;;  %v855_v40 = vmax.f32 %v516_v23, 0.0  ;;  %v857_v41 = vmax.f32 %v709_v24, 0.0 }
 0x124   :  { %v520_v21 = vadd.f32 %v519_v18, %v2392_v28  ;;  %v713_v22 = vadd.f32 %v712_v19, %v2394_v29  ;;  %1359 = vmatprep.mubr.bf16.mxu0 %v988_v13  ;;  %1520 = vmatprep.mubr.bf16.mxu1 %v990_v14  ;;  %v856_v36 = vmax.f32 %v518_v17, 0.0  ;;  %v858_v37 = vmax.f32 %v711_v20, 0.0 }
 0x125   :  { %v521_v25 = vpop.f32.mrf.mxu0  ;;  %v714_v26 = vpop.f32.mrf.mxu1  ;;  %1360 = vmatmul.mubr.bf16.gmra.mxu0 %v987_v15  ;;  %1521 = vmatmul.mubr.bf16.gmra.mxu1 %v989_v16 }
 0x126   :  { %v522_v30 = vadd.f32 %v521_v25, %v2388_v27  ;;  %v715_v31 = vadd.f32 %v714_v26, %v2390_v0  ;;  %v859_v32 = vmax.f32 %v520_v21, 0.0  ;;  %v861_v33 = vmax.f32 %v713_v22, 0.0 }
 0x127   :  { %v525_v34 = vpop.f32.mrf.mxu0  ;;  %v718_v35 = vpop.f32.mrf.mxu1 }
 0x128   :  { %v860_v38 = vmax.f32 %v522_v30, 0.0  ;;  %v862_v39 = vmax.f32 %v715_v31, 0.0  ;;  %v991_v46 = vpack.c.bf16 %v859_v32, %v855_v40  ;;  %v993_v47 = vpack.c.bf16 %v861_v33, %v857_v41 }
 0x129   :  { %v527_v42 = vpop.f32.mrf.mxu0  ;;  %v720_v43 = vpop.f32.mrf.mxu1  ;;  %v526_v54 = vadd.f32 %v525_v34, %v2392_v28  ;;  %v719_v55 = vadd.f32 %v718_v35, %v2394_v29 }
 0x12a   :  { %v992_v44 = vpack.c.bf16 %v860_v38, %v856_v36  ;;  %v994_v45 = vpack.c.bf16 %v862_v39, %v858_v37  ;;  %v528_v48 = vadd.f32 %v527_v42, %v2388_v27  ;;  %v721_v51 = vadd.f32 %v720_v43, %v2390_v0 }
 0x12b   :  { %v529_v49 = vpop.f32.mrf.mxu0  ;;  %v722_v50 = vpop.f32.mrf.mxu1  ;;  %v863_v5 = vmax.f32 %v526_v54, 0.0  ;;  %v865_v6 = vmax.f32 %v719_v55, 0.0 }
 0x12c   :  { %v530_v52 = vadd.f32 %v529_v49, %v2392_v28  ;;  %v723_v53 = vadd.f32 %v722_v50, %v2394_v29  ;;  %1367 = vmatprep.mubr.bf16.mxu0 %v992_v44  ;;  %1528 = vmatprep.mubr.bf16.mxu1 %v994_v45  ;;  %v864_v1 = vmax.f32 %v528_v48, 0.0  ;;  %v866_v2 = vmax.f32 %v721_v51, 0.0 }
 0x12d   :  { %v531_v56 = vpop.f32.mrf.mxu0  ;;  %v724_v57 = vpop.f32.mrf.mxu1  ;;  %1368 = vmatmul.mubr.bf16.gmra.mxu0 %v991_v46  ;;  %1529 = vmatmul.mubr.bf16.gmra.mxu1 %v993_v47 }
 0x12e   :  { %v532_v58 = vadd.f32 %v531_v56, %v2388_v27  ;;  %v725_v59 = vadd.f32 %v724_v57, %v2390_v0  ;;  %v867_v60 = vmax.f32 %v530_v52, 0.0  ;;  %v869_v61 = vmax.f32 %v723_v53, 0.0 }
 0x12f   :  { %v535_v62 = vpop.f32.mrf.mxu0  ;;  %v728_v63 = vpop.f32.mrf.mxu1 }
 0x130   :  { %v868_v3 = vmax.f32 %v532_v58, 0.0  ;;  %v870_v4 = vmax.f32 %v725_v59, 0.0  ;;  %v995_v11 = vpack.c.bf16 %v867_v60, %v863_v5  ;;  %v997_v12 = vpack.c.bf16 %v869_v61, %v865_v6 }
 0x131   :  { %v537_v7 = vpop.f32.mrf.mxu0  ;;  %v730_v8 = vpop.f32.mrf.mxu1  ;;  %v536_v19 = vadd.f32 %v535_v62, %v2392_v28  ;;  %v729_v20 = vadd.f32 %v728_v63, %v2394_v29 }
 0x132   :  { %v996_v9 = vpack.c.bf16 %v868_v3, %v864_v1  ;;  %v998_v10 = vpack.c.bf16 %v870_v4, %v866_v2  ;;  %v538_v13 = vadd.f32 %v537_v7, %v2388_v27  ;;  %v731_v16 = vadd.f32 %v730_v8, %v2390_v0 }
 0x133   :  { %v539_v14 = vpop.f32.mrf.mxu0  ;;  %v732_v15 = vpop.f32.mrf.mxu1  ;;  %v871_v36 = vmax.f32 %v536_v19, 0.0  ;;  %v873_v37 = vmax.f32 %v729_v20, 0.0 }
 0x134   :  { %v540_v17 = vadd.f32 %v539_v14, %v2392_v28  ;;  %v733_v18 = vadd.f32 %v732_v15, %v2394_v29  ;;  %1375 = vmatprep.mubr.bf16.mxu0 %v996_v9  ;;  %1536 = vmatprep.mubr.bf16.mxu1 %v998_v10  ;;  %v872_v32 = vmax.f32 %v538_v13, 0.0  ;;  %v874_v33 = vmax.f32 %v731_v16, 0.0 }
 0x135   :  { %v541_v21 = vpop.f32.mrf.mxu0  ;;  %v734_v22 = vpop.f32.mrf.mxu1  ;;  %1376 = vmatmul.mubr.bf16.gmra.mxu0 %v995_v11  ;;  %1537 = vmatmul.mubr.bf16.gmra.mxu1 %v997_v12 }
 0x136   :  { %v542_v23 = vadd.f32 %v541_v21, %v2388_v27  ;;  %v735_v24 = vadd.f32 %v734_v22, %v2390_v0  ;;  %v875_v25 = vmax.f32 %v540_v17, 0.0  ;;  %v877_v26 = vmax.f32 %v733_v18, 0.0 }
 0x137   :  { %v545_v30 = vpop.f32.mrf.mxu0  ;;  %v738_v31 = vpop.f32.mrf.mxu1 }
 0x138   :  { %v876_v34 = vmax.f32 %v542_v23, 0.0  ;;  %v878_v35 = vmax.f32 %v735_v24, 0.0  ;;  %v999_v42 = vpack.c.bf16 %v875_v25, %v871_v36  ;;  %v1001_v43 = vpack.c.bf16 %v877_v26, %v873_v37 }
 0x139   :  { %v547_v38 = vpop.f32.mrf.mxu0  ;;  %v740_v39 = vpop.f32.mrf.mxu1  ;;  %v546_v50 = vadd.f32 %v545_v30, %v2392_v28  ;;  %v739_v51 = vadd.f32 %v738_v31, %v2394_v29 }
 0x13a   :  { %v1000_v40 = vpack.c.bf16 %v876_v34, %v872_v32  ;;  %v1002_v41 = vpack.c.bf16 %v878_v35, %v874_v33  ;;  %v548_v44 = vadd.f32 %v547_v38, %v2388_v27  ;;  %v741_v47 = vadd.f32 %v740_v39, %v2390_v0 }
 0x13b   :  { %v549_v45 = vpop.f32.mrf.mxu0  ;;  %v742_v46 = vpop.f32.mrf.mxu1  ;;  %v879_v1 = vmax.f32 %v546_v50, 0.0  ;;  %v881_v2 = vmax.f32 %v739_v51, 0.0 }
 0x13c   :  { %v550_v48 = vadd.f32 %v549_v45, %v2392_v28  ;;  %v743_v49 = vadd.f32 %v742_v46, %v2394_v29  ;;  %1383 = vmatprep.mubr.bf16.mxu0 %v1000_v40  ;;  %1544 = vmatprep.mubr.bf16.mxu1 %v1002_v41  ;;  %v880_v60 = vmax.f32 %v548_v44, 0.0  ;;  %v882_v61 = vmax.f32 %v741_v47, 0.0 }
 0x13d   :  { %v551_v52 = vpop.f32.mrf.mxu0  ;;  %v744_v53 = vpop.f32.mrf.mxu1  ;;  %1384 = vmatmul.mubr.bf16.gmra.mxu0 %v999_v42  ;;  %1545 = vmatmul.mubr.bf16.gmra.mxu1 %v1001_v43 }
 0x13e   :  { %v552_v54 = vadd.f32 %v551_v52, %v2388_v27  ;;  %v745_v55 = vadd.f32 %v744_v53, %v2390_v0  ;;  %v883_v56 = vmax.f32 %v550_v48, 0.0  ;;  %v885_v57 = vmax.f32 %v743_v49, 0.0 }
 0x13f   :  { %v555_v58 = vpop.f32.mrf.mxu0  ;;  %v748_v59 = vpop.f32.mrf.mxu1 }
 0x140   :  { %v884_v62 = vmax.f32 %v552_v54, 0.0  ;;  %v886_v63 = vmax.f32 %v745_v55, 0.0  ;;  %v1003_v7 = vpack.c.bf16 %v883_v56, %v879_v1  ;;  %v1005_v8 = vpack.c.bf16 %v885_v57, %v881_v2 }
 0x141   :  { %v557_v3 = vpop.f32.mrf.mxu0  ;;  %v750_v4 = vpop.f32.mrf.mxu1  ;;  %v556_v15 = vadd.f32 %v555_v58, %v2392_v28  ;;  %v749_v16 = vadd.f32 %v748_v59, %v2394_v29 }
 0x142   :  { %v1004_v5 = vpack.c.bf16 %v884_v62, %v880_v60  ;;  %v1006_v6 = vpack.c.bf16 %v886_v63, %v882_v61  ;;  %v558_v9 = vadd.f32 %v557_v3, %v2388_v27  ;;  %v751_v12 = vadd.f32 %v750_v4, %v2390_v0 }
 0x143   :  { %v559_v10 = vpop.f32.mrf.mxu0  ;;  %v752_v11 = vpop.f32.mrf.mxu1  ;;  %v887_v32 = vmax.f32 %v556_v15, 0.0  ;;  %v889_v33 = vmax.f32 %v749_v16, 0.0 }
 0x144   :  { %v560_v13 = vadd.f32 %v559_v10, %v2392_v28  ;;  %v753_v14 = vadd.f32 %v752_v11, %v2394_v29  ;;  %1391 = vmatprep.mubr.bf16.mxu0 %v1004_v5  ;;  %1552 = vmatprep.mubr.bf16.mxu1 %v1006_v6  ;;  %v888_v25 = vmax.f32 %v558_v9, 0.0  ;;  %v890_v26 = vmax.f32 %v751_v12, 0.0 }
 0x145   :  { %v561_v17 = vpop.f32.mrf.mxu0  ;;  %v754_v18 = vpop.f32.mrf.mxu1  ;;  %1392 = vmatmul.mubr.bf16.gmra.mxu0 %v1003_v7  ;;  %1553 = vmatmul.mubr.bf16.gmra.mxu1 %v1005_v8 }
 0x146   :  { %v562_v19 = vadd.f32 %v561_v17, %v2388_v27  ;;  %v755_v20 = vadd.f32 %v754_v18, %v2390_v0  ;;  %v891_v21 = vmax.f32 %v560_v13, 0.0  ;;  %v893_v22 = vmax.f32 %v753_v14, 0.0 }
 0x147   :  { %v565_v23 = vpop.f32.mrf.mxu0  ;;  %v758_v24 = vpop.f32.mrf.mxu1 }
 0x148   :  { %v892_v30 = vmax.f32 %v562_v19, 0.0  ;;  %v894_v31 = vmax.f32 %v755_v20, 0.0  ;;  %v1007_v38 = vpack.c.bf16 %v891_v21, %v887_v32  ;;  %v1009_v39 = vpack.c.bf16 %v893_v22, %v889_v33 }
 0x149   :  { %v567_v34 = vpop.f32.mrf.mxu0  ;;  %v760_v35 = vpop.f32.mrf.mxu1  ;;  %v566_v46 = vadd.f32 %v565_v23, %v2392_v28  ;;  %v759_v47 = vadd.f32 %v758_v24, %v2394_v29 }
 0x14a   :  { %v1008_v36 = vpack.c.bf16 %v892_v30, %v888_v25  ;;  %v1010_v37 = vpack.c.bf16 %v894_v31, %v890_v26  ;;  %v568_v40 = vadd.f32 %v567_v34, %v2388_v27  ;;  %v761_v43 = vadd.f32 %v760_v35, %v2390_v0 }
 0x14b   :  { %v569_v41 = vpop.f32.mrf.mxu0  ;;  %v762_v42 = vpop.f32.mrf.mxu1  ;;  %v895_v60 = vmax.f32 %v566_v46, 0.0  ;;  %v897_v61 = vmax.f32 %v759_v47, 0.0 }
 0x14c   :  { %v570_v44 = vadd.f32 %v569_v41, %v2392_v28  ;;  %v763_v45 = vadd.f32 %v762_v42, %v2394_v29  ;;  %1399 = vmatprep.mubr.bf16.mxu0 %v1008_v36  ;;  %1560 = vmatprep.mubr.bf16.mxu1 %v1010_v37  ;;  %v896_v56 = vmax.f32 %v568_v40, 0.0  ;;  %v898_v57 = vmax.f32 %v761_v43, 0.0 }
 0x14d   :  { %v571_v48 = vpop.f32.mrf.mxu0  ;;  %v764_v49 = vpop.f32.mrf.mxu1  ;;  %1400 = vmatmul.mubr.bf16.gmra.mxu0 %v1007_v38  ;;  %1561 = vmatmul.mubr.bf16.gmra.mxu1 %v1009_v39 }
 0x14e   :  { %v572_v50 = vadd.f32 %v571_v48, %v2388_v27  ;;  %v765_v51 = vadd.f32 %v764_v49, %v2390_v0  ;;  %v899_v52 = vmax.f32 %v570_v44, 0.0  ;;  %v901_v53 = vmax.f32 %v763_v45, 0.0 }
 0x14f   :  { %v575_v54 = vpop.f32.mrf.mxu0  ;;  %v768_v55 = vpop.f32.mrf.mxu1 }
 0x150   :  { %v900_v58 = vmax.f32 %v572_v50, 0.0  ;;  %v902_v59 = vmax.f32 %v765_v51, 0.0  ;;  %v1011_v3 = vpack.c.bf16 %v899_v52, %v895_v60  ;;  %v1013_v4 = vpack.c.bf16 %v901_v53, %v897_v61 }
 0x151   :  { %v577_v62 = vpop.f32.mrf.mxu0  ;;  %v770_v63 = vpop.f32.mrf.mxu1  ;;  %v576_v11 = vadd.f32 %v575_v54, %v2392_v28  ;;  %v769_v12 = vadd.f32 %v768_v55, %v2394_v29 }
 0x152   :  { %v1012_v1 = vpack.c.bf16 %v900_v58, %v896_v56  ;;  %v1014_v2 = vpack.c.bf16 %v902_v59, %v898_v57  ;;  %v578_v5 = vadd.f32 %v577_v62, %v2388_v27  ;;  %v771_v8 = vadd.f32 %v770_v63, %v2390_v0 }
 0x153   :  { %v579_v6 = vpop.f32.mrf.mxu0  ;;  %v772_v7 = vpop.f32.mrf.mxu1  ;;  %v903_v25 = vmax.f32 %v576_v11, 0.0  ;;  %v905_v26 = vmax.f32 %v769_v12, 0.0 }
 0x154   :  { %v580_v9 = vadd.f32 %v579_v6, %v2392_v28  ;;  %v773_v10 = vadd.f32 %v772_v7, %v2394_v29  ;;  %1407 = vmatprep.mubr.bf16.mxu0 %v1012_v1  ;;  %1568 = vmatprep.mubr.bf16.mxu1 %v1014_v2  ;;  %v904_v21 = vmax.f32 %v578_v5, 0.0  ;;  %v906_v22 = vmax.f32 %v771_v8, 0.0 }
 0x155   :  { %v581_v13 = vpop.f32.mrf.mxu0  ;;  %v774_v14 = vpop.f32.mrf.mxu1  ;;  %1408 = vmatmul.mubr.bf16.gmra.mxu0 %v1011_v3  ;;  %1569 = vmatmul.mubr.bf16.gmra.mxu1 %v1013_v4 }
 0x156   :  { %v582_v15 = vadd.f32 %v581_v13, %v2388_v27  ;;  %v775_v16 = vadd.f32 %v774_v14, %v2390_v0  ;;  %v907_v17 = vmax.f32 %v580_v9, 0.0  ;;  %v909_v18 = vmax.f32 %v773_v10, 0.0 }
 0x157   :  { %v585_v19 = vpop.f32.mrf.mxu0  ;;  %v778_v20 = vpop.f32.mrf.mxu1 }
 0x158   :  { %v908_v23 = vmax.f32 %v582_v15, 0.0  ;;  %v910_v24 = vmax.f32 %v775_v16, 0.0  ;;  %v1015_v34 = vpack.c.bf16 %v907_v17, %v903_v25  ;;  %v1017_v35 = vpack.c.bf16 %v909_v18, %v905_v26 }
 0x159   :  { %v587_v30 = vpop.f32.mrf.mxu0  ;;  %v780_v31 = vpop.f32.mrf.mxu1  ;;  %v586_v42 = vadd.f32 %v585_v19, %v2392_v28  ;;  %v779_v43 = vadd.f32 %v778_v20, %v2394_v29 }
 0x15a   :  { %v1016_v32 = vpack.c.bf16 %v908_v23, %v904_v21  ;;  %v1018_v33 = vpack.c.bf16 %v910_v24, %v906_v22  ;;  %v588_v36 = vadd.f32 %v587_v30, %v2388_v27  ;;  %v781_v39 = vadd.f32 %v780_v31, %v2390_v0 }
 0x15b   :  { %v589_v37 = vpop.f32.mrf.mxu0  ;;  %v782_v38 = vpop.f32.mrf.mxu1  ;;  %v911_v56 = vmax.f32 %v586_v42, 0.0  ;;  %v913_v57 = vmax.f32 %v779_v43, 0.0 }
 0x15c   :  { %v590_v40 = vadd.f32 %v589_v37, %v2392_v28  ;;  %v783_v41 = vadd.f32 %v782_v38, %v2394_v29  ;;  %1415 = vmatprep.mubr.bf16.mxu0 %v1016_v32  ;;  %1576 = vmatprep.mubr.bf16.mxu1 %v1018_v33  ;;  %v912_v52 = vmax.f32 %v588_v36, 0.0  ;;  %v914_v53 = vmax.f32 %v781_v39, 0.0 }
 0x15d   :  { %v591_v44 = vpop.f32.mrf.mxu0  ;;  %v784_v45 = vpop.f32.mrf.mxu1  ;;  %1416 = vmatmul.mubr.bf16.gmra.mxu0 %v1015_v34  ;;  %1577 = vmatmul.mubr.bf16.gmra.mxu1 %v1017_v35 }
 0x15e   :  { %v592_v46 = vadd.f32 %v591_v44, %v2388_v27  ;;  %v785_v47 = vadd.f32 %v784_v45, %v2390_v0  ;;  %v915_v48 = vmax.f32 %v590_v40, 0.0  ;;  %v917_v49 = vmax.f32 %v783_v41, 0.0 }
 0x15f   :  { %v595_v50 = vpop.f32.mrf.mxu0  ;;  %v788_v51 = vpop.f32.mrf.mxu1 }
 0x160   :  { %v916_v54 = vmax.f32 %v592_v46, 0.0  ;;  %v918_v55 = vmax.f32 %v785_v47, 0.0  ;;  %v1019_v62 = vpack.c.bf16 %v915_v48, %v911_v56  ;;  %v1021_v63 = vpack.c.bf16 %v917_v49, %v913_v57 }
 0x161   :  { %v597_v58 = vpop.f32.mrf.mxu0  ;;  %v790_v59 = vpop.f32.mrf.mxu1  ;;  %v596_v7 = vadd.f32 %v595_v50, %v2392_v28  ;;  %v789_v8 = vadd.f32 %v788_v51, %v2394_v29 }
 0x162   :  { %v1020_v60 = vpack.c.bf16 %v916_v54, %v912_v52  ;;  %v1022_v61 = vpack.c.bf16 %v918_v55, %v914_v53  ;;  %v598_v1 = vadd.f32 %v597_v58, %v2388_v27  ;;  %v791_v4 = vadd.f32 %v790_v59, %v2390_v0  ;;  %v2527_v58 = vld [vmem:[%s2661_s4] ss:$0 sm:$0xff] }
 0x163   :  { %v599_v2 = vpop.f32.mrf.mxu0  ;;  %v792_v3 = vpop.f32.mrf.mxu1  ;;  %v919_v21 = vmax.f32 %v596_v7, 0.0  ;;  %v921_v22 = vmax.f32 %v789_v8, 0.0 }
 0x164   :  { %v600_v5 = vadd.f32 %v599_v2, %v2392_v28  ;;  %v793_v6 = vadd.f32 %v792_v3, %v2394_v29  ;;  %1423 = vmatprep.mubr.bf16.mxu0 %v1020_v60  ;;  %1584 = vmatprep.mubr.bf16.mxu1 %v1022_v61  ;;  %v920_v17 = vmax.f32 %v598_v1, 0.0  ;;  %v922_v18 = vmax.f32 %v791_v4, 0.0 }
 0x165   :  { %v601_v9 = vpop.f32.mrf.mxu0  ;;  %v794_v10 = vpop.f32.mrf.mxu1  ;;  %1424 = vmatmul.mubr.bf16.gmra.mxu0 %v1019_v62  ;;  %1585 = vmatmul.mubr.bf16.gmra.mxu1 %v1021_v63 }
 0x166   :  { %v602_v11 = vadd.f32 %v601_v9, %v2388_v27  ;;  %v795_v12 = vadd.f32 %v794_v10, %v2390_v0  ;;  %v923_v13 = vmax.f32 %v600_v5, 0.0  ;;  %v925_v14 = vmax.f32 %v793_v6, 0.0 }
 0x167   :  { %v605_v15 = vpop.f32.mrf.mxu0  ;;  %v798_v16 = vpop.f32.mrf.mxu1 }
 0x168   :  { %v924_v19 = vmax.f32 %v602_v11, 0.0  ;;  %v926_v20 = vmax.f32 %v795_v12, 0.0  ;;  %v1023_v30 = vpack.c.bf16 %v923_v13, %v919_v21  ;;  %v1025_v31 = vpack.c.bf16 %v925_v14, %v921_v22 }
 0x169   :  { %v607_v23 = vpop.f32.mrf.mxu0  ;;  %v800_v24 = vpop.f32.mrf.mxu1  ;;  %v606_v38 = vadd.f32 %v605_v15, %v2392_v28  ;;  %v799_v39 = vadd.f32 %v798_v16, %v2394_v29 }
 0x16a   :  { %v1024_v25 = vpack.c.bf16 %v924_v19, %v920_v17  ;;  %v1026_v26 = vpack.c.bf16 %v926_v20, %v922_v18  ;;  %v608_v32 = vadd.f32 %v607_v23, %v2388_v27  ;;  %v801_v35 = vadd.f32 %v800_v24, %v2390_v0 }
 0x16b   :  { %v609_v33 = vpop.f32.mrf.mxu0  ;;  %v802_v34 = vpop.f32.mrf.mxu1  ;;  %v927_v50 = vmax.f32 %v606_v38, 0.0  ;;  %v929_v51 = vmax.f32 %v799_v39, 0.0 }
 0x16c   :  { %v610_v36 = vadd.f32 %v609_v33, %v2392_v28  ;;  %v803_v37 = vadd.f32 %v802_v34, %v2394_v29  ;;  %1431 = vmatprep.mubr.bf16.mxu0 %v1024_v25  ;;  %1592 = vmatprep.mubr.bf16.mxu1 %v1026_v26  ;;  %v928_v46 = vmax.f32 %v608_v32, 0.0  ;;  %v930_v47 = vmax.f32 %v801_v35, 0.0 }
 0x16d   :  { %v611_v40 = vpop.f32.mrf.mxu0  ;;  %v804_v41 = vpop.f32.mrf.mxu1  ;;  %1432 = vmatmul.mubr.bf16.gmra.mxu0 %v1023_v30  ;;  %1593 = vmatmul.mubr.bf16.gmra.mxu1 %v1025_v31 }
 0x16e   :  { %v612_v42 = vadd.f32 %v611_v40, %v2388_v27  ;;  %v805_v43 = vadd.f32 %v804_v41, %v2390_v0  ;;  %v931_v44 = vmax.f32 %v610_v36, 0.0  ;;  %v933_v45 = vmax.f32 %v803_v37, 0.0 }
 0x170   :  { %v932_v48 = vmax.f32 %v612_v42, 0.0  ;;  %v934_v49 = vmax.f32 %v805_v43, 0.0  ;;  %v1027_v53 = vpack.c.bf16 %v931_v44, %v927_v50  ;;  %v1029_v29 = vpack.c.bf16 %v933_v45, %v929_v51 }
 0x172   :  { %v1028_v52 = vpack.c.bf16 %v932_v48, %v928_v46  ;;  %v1030_v28 = vpack.c.bf16 %v934_v49, %v930_v47 }
 0x174   :  { %1439 = vmatprep.mubr.bf16.mxu0 %v1028_v52  ;;  %1600 = vmatprep.mubr.bf16.mxu1 %v1030_v28 }
 0x175   :  { %1440 = vmatmul.mubr.bf16.gmra.mxu0 %v1027_v53  ;;  %1601 = vmatmul.mubr.bf16.gmra.mxu1 %v1029_v29 }
 0x1bd   :  { %v1842_v54 = vpop.f32.mrf.mxu0  ;;  %v1954_v27 = vpop.f32.mrf.mxu1 }
 0x1bf   :  { %v1843_v55 = vpop.f32.mrf.mxu0  ;;  %v1955_v0 = vpop.f32.mrf.mxu1 }
 0x1c0   :  { %v1844_v56 = vadd.f32 %v1843_v55, %v1842_v54  ;;  %v1956_v57 = vadd.f32 %v1955_v0, %v1954_v27 }
 0x1c1   :  { %v1845_v59 = vpop.f32.mrf.mxu0  ;;  %v1957_v60 = vpop.f32.mrf.mxu1 }
 0x1c2   :  { %v1483_v61 = vadd.f32 %v1956_v57, %v1844_v56 }
 0x1c3   :  { %v1846_v62 = vpop.f32.mrf.mxu0  ;;  %v1958_v63 = vpop.f32.mrf.mxu1 }
 0x1c4   :  { %v1609_v1 = vadd.f32 %v2527_v58, %v1483_v61  ;;  %v1847_v2 = vadd.f32 %v1846_v62, %v1845_v59  ;;  %v1959_v3 = vadd.f32 %v1958_v63, %v1957_v60 }
 0x1c5   :  { %v1848_v4 = vpop.f32.mrf.mxu0  ;;  %v1960_v5 = vpop.f32.mrf.mxu1 }
 0x1c6   :  { %1708 = vst [vmem:[%s2662_s5] sm:$0xff] %v1609_v1  ;;  %v1486_v6 = vadd.f32 %v1959_v3, %v1847_v2 }
 0x1c7   :  { %v1849_v7 = vpop.f32.mrf.mxu0  ;;  %v1961_v8 = vpop.f32.mrf.mxu1 }
 0x1c8   :  { %v1610_v9 = vadd.f32 %v2527_v58, %v1486_v6  ;;  %v1850_v10 = vadd.f32 %v1849_v7, %v1848_v4  ;;  %v1962_v11 = vadd.f32 %v1961_v8, %v1960_v5 }
 0x1c9   :  { %v1851_v12 = vpop.f32.mrf.mxu0  ;;  %v1963_v13 = vpop.f32.mrf.mxu1 }
 0x1ca   :  { %1709 = vst [vmem:[%s2662_s5 + $0x8] sm:$0xff] %v1610_v9  ;;  %v1491_v14 = vadd.f32 %v1962_v11, %v1850_v10 }
 0x1cb   :  { %v1852_v15 = vpop.f32.mrf.mxu0  ;;  %v1964_v16 = vpop.f32.mrf.mxu1 }
 0x1cc   :  { %v1611_v17 = vadd.f32 %v2527_v58, %v1491_v14  ;;  %v1853_v18 = vadd.f32 %v1852_v15, %v1851_v12  ;;  %v1965_v19 = vadd.f32 %v1964_v16, %v1963_v13 }
 0x1cd   :  { %v1854_v20 = vpop.f32.mrf.mxu0  ;;  %v1966_v21 = vpop.f32.mrf.mxu1 }
 0x1ce   :  { %1710 = vst [vmem:[%s2662_s5 + $0x10] sm:$0xff] %v1611_v17  ;;  %v1494_v22 = vadd.f32 %v1965_v19, %v1853_v18 }
 0x1cf   :  { %v1855_v23 = vpop.f32.mrf.mxu0  ;;  %v1967_v24 = vpop.f32.mrf.mxu1 }
 0x1d0   :  { %v1612_v25 = vadd.f32 %v2527_v58, %v1494_v22  ;;  %v1856_v26 = vadd.f32 %v1855_v23, %v1854_v20  ;;  %v1968_v30 = vadd.f32 %v1967_v24, %v1966_v21 }
 0x1d1   :  { %v1857_v31 = vpop.f32.mrf.mxu0  ;;  %v1969_v32 = vpop.f32.mrf.mxu1 }
 0x1d2   :  { %1711 = vst [vmem:[%s2662_s5 + $0x18] sm:$0xff] %v1612_v25  ;;  %v1499_v33 = vadd.f32 %v1968_v30, %v1856_v26 }
 0x1d3   :  { %v1858_v34 = vpop.f32.mrf.mxu0  ;;  %v1970_v35 = vpop.f32.mrf.mxu1 }
 0x1d4   :  { %v1613_v36 = vadd.f32 %v2527_v58, %v1499_v33  ;;  %v1859_v37 = vadd.f32 %v1858_v34, %v1857_v31  ;;  %v1971_v38 = vadd.f32 %v1970_v35, %v1969_v32 }
 0x1d5   :  { %v1860_v39 = vpop.f32.mrf.mxu0  ;;  %v1972_v40 = vpop.f32.mrf.mxu1 }
 0x1d6   :  { %1712 = vst [vmem:[%s2662_s5 + $0x20] sm:$0xff] %v1613_v36  ;;  %v1502_v41 = vadd.f32 %v1971_v38, %v1859_v37 }
 0x1d7   :  { %v1861_v42 = vpop.f32.mrf.mxu0  ;;  %v1973_v43 = vpop.f32.mrf.mxu1 }
 0x1d8   :  { %v1614_v44 = vadd.f32 %v2527_v58, %v1502_v41  ;;  %v1862_v45 = vadd.f32 %v1861_v42, %v1860_v39  ;;  %v1974_v46 = vadd.f32 %v1973_v43, %v1972_v40 }
 0x1d9   :  { %v1863_v47 = vpop.f32.mrf.mxu0  ;;  %v1975_v48 = vpop.f32.mrf.mxu1 }
 0x1da   :  { %1713 = vst [vmem:[%s2662_s5 + $0x28] sm:$0xff] %v1614_v44  ;;  %v1507_v49 = vadd.f32 %v1974_v46, %v1862_v45 }
 0x1db   :  { %v1864_v50 = vpop.f32.mrf.mxu0  ;;  %v1976_v51 = vpop.f32.mrf.mxu1 }
 0x1dc   :  { %v1615_v52 = vadd.f32 %v2527_v58, %v1507_v49  ;;  %v1865_v28 = vadd.f32 %v1864_v50, %v1863_v47  ;;  %v1977_v53 = vadd.f32 %v1976_v51, %v1975_v48 }
 0x1dd   :  { %v1866_v29 = vpop.f32.mrf.mxu0  ;;  %v1978_v54 = vpop.f32.mrf.mxu1 }
 0x1de   :  { %1714 = vst [vmem:[%s2662_s5 + $0x30] sm:$0xff] %v1615_v52  ;;  %v1510_v27 = vadd.f32 %v1977_v53, %v1865_v28 }
 0x1df   :  { %v1867_v55 = vpop.f32.mrf.mxu0  ;;  %v1979_v0 = vpop.f32.mrf.mxu1 }
 0x1e0   :  { %v1616_v56 = vadd.f32 %v2527_v58, %v1510_v27  ;;  %v1868_v57 = vadd.f32 %v1867_v55, %v1866_v29  ;;  %v1980_v59 = vadd.f32 %v1979_v0, %v1978_v54 }
 0x1e1   :  { %v1869_v60 = vpop.f32.mrf.mxu0  ;;  %v1981_v61 = vpop.f32.mrf.mxu1 }
 0x1e2   :  { %1715 = vst [vmem:[%s2662_s5 + $0x38] sm:$0xff] %v1616_v56  ;;  %v1515_v62 = vadd.f32 %v1980_v59, %v1868_v57 }
 0x1e3   :  { %v1870_v63 = vpop.f32.mrf.mxu0  ;;  %v1982_v1 = vpop.f32.mrf.mxu1 }
 0x1e4   :  { %v1617_v2 = vadd.f32 %v2527_v58, %v1515_v62  ;;  %v1871_v3 = vadd.f32 %v1870_v63, %v1869_v60  ;;  %v1983_v4 = vadd.f32 %v1982_v1, %v1981_v61 }
 0x1e5   :  { %v1872_v5 = vpop.f32.mrf.mxu0  ;;  %v1984_v6 = vpop.f32.mrf.mxu1 }
 0x1e6   :  { %1716 = vst [vmem:[%s2662_s5 + $0x40] sm:$0xff] %v1617_v2  ;;  %v1518_v7 = vadd.f32 %v1983_v4, %v1871_v3 }
 0x1e7   :  { %v1873_v8 = vpop.f32.mrf.mxu0  ;;  %v1985_v9 = vpop.f32.mrf.mxu1 }
 0x1e8   :  { %v1618_v10 = vadd.f32 %v2527_v58, %v1518_v7  ;;  %v1874_v11 = vadd.f32 %v1873_v8, %v1872_v5  ;;  %v1986_v12 = vadd.f32 %v1985_v9, %v1984_v6 }
 0x1e9   :  { %v1875_v13 = vpop.f32.mrf.mxu0  ;;  %v1987_v14 = vpop.f32.mrf.mxu1 }
 0x1ea   :  { %1717 = vst [vmem:[%s2662_s5 + $0x48] sm:$0xff] %v1618_v10  ;;  %v1523_v15 = vadd.f32 %v1986_v12, %v1874_v11 }
 0x1eb   :  { %v1876_v16 = vpop.f32.mrf.mxu0  ;;  %v1988_v17 = vpop.f32.mrf.mxu1 }
 0x1ec   :  { %v1619_v18 = vadd.f32 %v2527_v58, %v1523_v15  ;;  %v1877_v19 = vadd.f32 %v1876_v16, %v1875_v13  ;;  %v1989_v20 = vadd.f32 %v1988_v17, %v1987_v14 }
 0x1ed   :  { %v1878_v21 = vpop.f32.mrf.mxu0  ;;  %v1990_v22 = vpop.f32.mrf.mxu1 }
 0x1ee   :  { %1718 = vst [vmem:[%s2662_s5 + $0x50] sm:$0xff] %v1619_v18  ;;  %v1526_v23 = vadd.f32 %v1989_v20, %v1877_v19 }
 0x1ef   :  { %v1879_v24 = vpop.f32.mrf.mxu0  ;;  %v1991_v25 = vpop.f32.mrf.mxu1 }
 0x1f0   :  { %v1620_v26 = vadd.f32 %v2527_v58, %v1526_v23  ;;  %v1880_v30 = vadd.f32 %v1879_v24, %v1878_v21  ;;  %v1992_v31 = vadd.f32 %v1991_v25, %v1990_v22 }
 0x1f1   :  { %v1881_v32 = vpop.f32.mrf.mxu0  ;;  %v1993_v33 = vpop.f32.mrf.mxu1 }
 0x1f2   :  { %1719 = vst [vmem:[%s2662_s5 + $0x58] sm:$0xff] %v1620_v26  ;;  %v1531_v34 = vadd.f32 %v1992_v31, %v1880_v30 }
 0x1f3   :  { %v1882_v35 = vpop.f32.mrf.mxu0  ;;  %v1994_v36 = vpop.f32.mrf.mxu1 }
 0x1f4   :  { %v1621_v37 = vadd.f32 %v2527_v58, %v1531_v34  ;;  %v1883_v38 = vadd.f32 %v1882_v35, %v1881_v32  ;;  %v1995_v39 = vadd.f32 %v1994_v36, %v1993_v33 }
 0x1f5   :  { %v1884_v40 = vpop.f32.mrf.mxu0  ;;  %v1996_v41 = vpop.f32.mrf.mxu1 }
 0x1f6   :  { %1720 = vst [vmem:[%s2662_s5 + $0x60] sm:$0xff] %v1621_v37  ;;  %v1534_v42 = vadd.f32 %v1995_v39, %v1883_v38 }
 0x1f7   :  { %v1885_v43 = vpop.f32.mrf.mxu0  ;;  %v1997_v44 = vpop.f32.mrf.mxu1 }
 0x1f8   :  { %v1622_v45 = vadd.f32 %v2527_v58, %v1534_v42  ;;  %v1886_v46 = vadd.f32 %v1885_v43, %v1884_v40  ;;  %v1998_v47 = vadd.f32 %v1997_v44, %v1996_v41 }
 0x1f9   :  { %v1887_v48 = vpop.f32.mrf.mxu0  ;;  %v1999_v49 = vpop.f32.mrf.mxu1 }
 0x1fa   :  { %1721 = vst [vmem:[%s2662_s5 + $0x68] sm:$0xff] %v1622_v45  ;;  %v1539_v50 = vadd.f32 %v1998_v47, %v1886_v46 }
 0x1fb   :  { %v1888_v51 = vpop.f32.mrf.mxu0  ;;  %v2000_v52 = vpop.f32.mrf.mxu1 }
 0x1fc   :  { %v1623_v28 = vadd.f32 %v2527_v58, %v1539_v50  ;;  %v1889_v53 = vadd.f32 %v1888_v51, %v1887_v48  ;;  %v2001_v29 = vadd.f32 %v2000_v52, %v1999_v49 }
 0x1fd   :  { %v1890_v54 = vpop.f32.mrf.mxu0  ;;  %v2002_v27 = vpop.f32.mrf.mxu1 }
 0x1fe   :  { %1722 = vst [vmem:[%s2662_s5 + $0x70] sm:$0xff] %v1623_v28  ;;  %v1542_v55 = vadd.f32 %v2001_v29, %v1889_v53 }
 0x1ff   :  { %v1891_v0 = vpop.f32.mrf.mxu0  ;;  %v2003_v56 = vpop.f32.mrf.mxu1 }
 0x200   :  { %v1624_v57 = vadd.f32 %v2527_v58, %v1542_v55  ;;  %v1892_v59 = vadd.f32 %v1891_v0, %v1890_v54  ;;  %v2004_v60 = vadd.f32 %v2003_v56, %v2002_v27 }
 0x201   :  { %v1893_v61 = vpop.f32.mrf.mxu0  ;;  %v2005_v62 = vpop.f32.mrf.mxu1 }
 0x202   :  { %1723 = vst [vmem:[%s2662_s5 + $0x78] sm:$0xff] %v1624_v57  ;;  %v1547_v63 = vadd.f32 %v2004_v60, %v1892_v59 }
 0x203   :  { %v1894_v1 = vpop.f32.mrf.mxu0  ;;  %v2006_v2 = vpop.f32.mrf.mxu1 }
 0x204   :  { %v1625_v3 = vadd.f32 %v2527_v58, %v1547_v63  ;;  %v1895_v4 = vadd.f32 %v1894_v1, %v1893_v61  ;;  %v2007_v5 = vadd.f32 %v2006_v2, %v2005_v62 }
 0x205   :  { %v1896_v6 = vpop.f32.mrf.mxu0  ;;  %v2008_v7 = vpop.f32.mrf.mxu1 }
 0x206   :  { %1724 = vst [vmem:[%s2662_s5 + $0x80] sm:$0xff] %v1625_v3  ;;  %v1550_v8 = vadd.f32 %v2007_v5, %v1895_v4 }
 0x207   :  { %v1897_v9 = vpop.f32.mrf.mxu0  ;;  %v2009_v10 = vpop.f32.mrf.mxu1 }
 0x208   :  { %v1626_v11 = vadd.f32 %v2527_v58, %v1550_v8  ;;  %v1898_v12 = vadd.f32 %v1897_v9, %v1896_v6  ;;  %v2010_v13 = vadd.f32 %v2009_v10, %v2008_v7 }
 0x209   :  { %v1899_v14 = vpop.f32.mrf.mxu0  ;;  %v2011_v15 = vpop.f32.mrf.mxu1 }
 0x20a   :  { %1725 = vst [vmem:[%s2662_s5 + $0x88] sm:$0xff] %v1626_v11  ;;  %v1555_v16 = vadd.f32 %v2010_v13, %v1898_v12 }
 0x20b   :  { %v1900_v17 = vpop.f32.mrf.mxu0  ;;  %v2012_v18 = vpop.f32.mrf.mxu1 }
 0x20c   :  { %v1627_v19 = vadd.f32 %v2527_v58, %v1555_v16  ;;  %v1901_v20 = vadd.f32 %v1900_v17, %v1899_v14  ;;  %v2013_v21 = vadd.f32 %v2012_v18, %v2011_v15 }
 0x20d   :  { %v1902_v22 = vpop.f32.mrf.mxu0  ;;  %v2014_v23 = vpop.f32.mrf.mxu1 }
 0x20e   :  { %1726 = vst [vmem:[%s2662_s5 + $0x90] sm:$0xff] %v1627_v19  ;;  %v1558_v24 = vadd.f32 %v2013_v21, %v1901_v20 }
 0x20f   :  { %v1903_v25 = vpop.f32.mrf.mxu0  ;;  %v2015_v26 = vpop.f32.mrf.mxu1 }
 0x210   :  { %v1628_v30 = vadd.f32 %v2527_v58, %v1558_v24  ;;  %v1904_v31 = vadd.f32 %v1903_v25, %v1902_v22  ;;  %v2016_v32 = vadd.f32 %v2015_v26, %v2014_v23 }
 0x211   :  { %v1905_v33 = vpop.f32.mrf.mxu0  ;;  %v2017_v34 = vpop.f32.mrf.mxu1 }
 0x212   :  { %1727 = vst [vmem:[%s2662_s5 + $0x98] sm:$0xff] %v1628_v30  ;;  %v1563_v35 = vadd.f32 %v2016_v32, %v1904_v31 }
 0x213   :  { %v1906_v36 = vpop.f32.mrf.mxu0  ;;  %v2018_v37 = vpop.f32.mrf.mxu1 }
 0x214   :  { %v1629_v38 = vadd.f32 %v2527_v58, %v1563_v35  ;;  %v1907_v39 = vadd.f32 %v1906_v36, %v1905_v33  ;;  %v2019_v40 = vadd.f32 %v2018_v37, %v2017_v34 }
 0x215   :  { %v1908_v41 = vpop.f32.mrf.mxu0  ;;  %v2020_v42 = vpop.f32.mrf.mxu1 }
 0x216   :  { %1728 = vst [vmem:[%s2662_s5 + $0xa0] sm:$0xff] %v1629_v38  ;;  %v1566_v43 = vadd.f32 %v2019_v40, %v1907_v39 }
 0x217   :  { %v1909_v44 = vpop.f32.mrf.mxu0  ;;  %v2021_v45 = vpop.f32.mrf.mxu1 }
 0x218   :  { %v1630_v46 = vadd.f32 %v2527_v58, %v1566_v43  ;;  %v1910_v47 = vadd.f32 %v1909_v44, %v1908_v41  ;;  %v2022_v48 = vadd.f32 %v2021_v45, %v2020_v42 }
 0x219   :  { %v1911_v49 = vpop.f32.mrf.mxu0  ;;  %v2023_v50 = vpop.f32.mrf.mxu1 }
 0x21a   :  { %1729 = vst [vmem:[%s2662_s5 + $0xa8] sm:$0xff] %v1630_v46  ;;  %v1571_v51 = vadd.f32 %v2022_v48, %v1910_v47 }
 0x21b   :  { %v1912_v52 = vpop.f32.mrf.mxu0  ;;  %v2024_v28 = vpop.f32.mrf.mxu1 }
 0x21c   :  { %v1631_v53 = vadd.f32 %v2527_v58, %v1571_v51  ;;  %v1913_v29 = vadd.f32 %v1912_v52, %v1911_v49  ;;  %v2025_v54 = vadd.f32 %v2024_v28, %v2023_v50 }
 0x21d   :  { %v1914_v27 = vpop.f32.mrf.mxu0  ;;  %v2026_v55 = vpop.f32.mrf.mxu1 }
 0x21e   :  { %1730 = vst [vmem:[%s2662_s5 + $0xb0] sm:$0xff] %v1631_v53  ;;  %v1574_v0 = vadd.f32 %v2025_v54, %v1913_v29 }
 0x21f   :  { %v1915_v56 = vpop.f32.mrf.mxu0  ;;  %v2027_v57 = vpop.f32.mrf.mxu1 }
 0x220   :  { %v1632_v59 = vadd.f32 %v2527_v58, %v1574_v0  ;;  %v1916_v60 = vadd.f32 %v1915_v56, %v1914_v27  ;;  %v2028_v61 = vadd.f32 %v2027_v57, %v2026_v55 }
 0x221   :  { %v1917_v62 = vpop.f32.mrf.mxu0  ;;  %v2029_v63 = vpop.f32.mrf.mxu1 }
 0x222   :  { %1731 = vst [vmem:[%s2662_s5 + $0xb8] sm:$0xff] %v1632_v59  ;;  %v1579_v1 = vadd.f32 %v2028_v61, %v1916_v60 }
 0x223   :  { %v1918_v2 = vpop.f32.mrf.mxu0  ;;  %v2030_v3 = vpop.f32.mrf.mxu1 }
 0x224   :  { %v1633_v4 = vadd.f32 %v2527_v58, %v1579_v1  ;;  %v1919_v5 = vadd.f32 %v1918_v2, %v1917_v62  ;;  %v2031_v6 = vadd.f32 %v2030_v3, %v2029_v63 }
 0x225   :  { %v1920_v7 = vpop.f32.mrf.mxu0  ;;  %v2032_v8 = vpop.f32.mrf.mxu1 }
 0x226   :  { %1732 = vst [vmem:[%s2662_s5 + $0xc0] sm:$0xff] %v1633_v4  ;;  %v1582_v9 = vadd.f32 %v2031_v6, %v1919_v5 }
 0x227   :  { %v1921_v10 = vpop.f32.mrf.mxu0  ;;  %v2033_v11 = vpop.f32.mrf.mxu1 }
 0x228   :  { %v1634_v12 = vadd.f32 %v2527_v58, %v1582_v9  ;;  %v1922_v13 = vadd.f32 %v1921_v10, %v1920_v7  ;;  %v2034_v14 = vadd.f32 %v2033_v11, %v2032_v8 }
 0x229   :  { %v1923_v15 = vpop.f32.mrf.mxu0  ;;  %v2035_v16 = vpop.f32.mrf.mxu1 }
 0x22a   :  { %1733 = vst [vmem:[%s2662_s5 + $0xc8] sm:$0xff] %v1634_v12  ;;  %v1587_v17 = vadd.f32 %v2034_v14, %v1922_v13 }
 0x22b   :  { %v1924_v18 = vpop.f32.mrf.mxu0  ;;  %v2036_v19 = vpop.f32.mrf.mxu1 }
 0x22c   :  { %v1635_v20 = vadd.f32 %v2527_v58, %v1587_v17  ;;  %v1925_v21 = vadd.f32 %v1924_v18, %v1923_v15  ;;  %v2037_v22 = vadd.f32 %v2036_v19, %v2035_v16 }
 0x22d   :  { %v1926_v23 = vpop.f32.mrf.mxu0  ;;  %v2038_v24 = vpop.f32.mrf.mxu1 }
 0x22e   :  { %1734 = vst [vmem:[%s2662_s5 + $0xd0] sm:$0xff] %v1635_v20  ;;  %v1590_v25 = vadd.f32 %v2037_v22, %v1925_v21 }
 0x22f   :  { %v1927_v26 = vpop.f32.mrf.mxu0  ;;  %v2039_v30 = vpop.f32.mrf.mxu1 }
 0x230   :  { %v1636_v31 = vadd.f32 %v2527_v58, %v1590_v25  ;;  %v1928_v32 = vadd.f32 %v1927_v26, %v1926_v23  ;;  %v2040_v33 = vadd.f32 %v2039_v30, %v2038_v24 }
 0x231   :  { %v1929_v34 = vpop.f32.mrf.mxu0  ;;  %v2041_v35 = vpop.f32.mrf.mxu1 }
 0x232   :  { %1735 = vst [vmem:[%s2662_s5 + $0xd8] sm:$0xff] %v1636_v31  ;;  %v1595_v36 = vadd.f32 %v2040_v33, %v1928_v32 }
 0x233   :  { %v1930_v37 = vpop.f32.mrf.mxu0  ;;  %v2042_v38 = vpop.f32.mrf.mxu1 }
 0x234   :  { %v1637_v39 = vadd.f32 %v2527_v58, %v1595_v36  ;;  %v1931_v40 = vadd.f32 %v1930_v37, %v1929_v34  ;;  %v2043_v41 = vadd.f32 %v2042_v38, %v2041_v35 }
 0x235   :  { %v1932_v42 = vpop.f32.mrf.mxu0  ;;  %v2044_v43 = vpop.f32.mrf.mxu1 }
 0x236   :  { %1736 = vst [vmem:[%s2662_s5 + $0xe0] sm:$0xff] %v1637_v39  ;;  %v1598_v44 = vadd.f32 %v2043_v41, %v1931_v40 }
 0x237   :  { %v1933_v45 = vpop.f32.mrf.mxu0  ;;  %v2045_v46 = vpop.f32.mrf.mxu1 }
 0x238   :  { %v1638_v47 = vadd.f32 %v2527_v58, %v1598_v44  ;;  %v1934_v48 = vadd.f32 %v1933_v45, %v1932_v42  ;;  %v2046_v49 = vadd.f32 %v2045_v46, %v2044_v43 }
 0x239   :  { %v1935_v50 = vpop.f32.mrf.mxu0  ;;  %v2047_v51 = vpop.f32.mrf.mxu1 }
 0x23a   :  { %1737 = vst [vmem:[%s2662_s5 + $0xe8] sm:$0xff] %v1638_v47  ;;  %v1603_v52 = vadd.f32 %v2046_v49, %v1934_v48 }
 0x23b   :  { %v1936_v28 = vpop.f32.mrf.mxu0  ;;  %v2048_v53 = vpop.f32.mrf.mxu1 }
 0x23c   :  { %v1639_v29 = vadd.f32 %v2527_v58, %v1603_v52  ;;  %v1937_v54 = vadd.f32 %v1936_v28, %v1935_v50  ;;  %v2049_v27 = vadd.f32 %v2048_v53, %v2047_v51 }
 0x23e   :  { %1738 = vst [vmem:[%s2662_s5 + $0xf0] sm:$0xff] %v1639_v29  ;;  %v1606_v55 = vadd.f32 %v2049_v27, %v1937_v54 }
 0x240   :  { %v1640_v0 = vadd.f32 %v2527_v58, %v1606_v55 }
 0x242   :  { %1739 = vst [vmem:[%s2662_s5 + $0xf8] sm:$0xff] %v1640_v0 }
 0x243   :  { %1744 = vsyncpa [#allocation4], 1 }

</bundles_post_ra>
